<compile_context>
chip_gen: v7x
topology: tpu7x:2x2x1
jax: 0.10.0
libtpu: 0.0.40
codegen_flags: <defaults>
</compile_context>

<pallas_src>
import numpy as np
import jax
import jax.numpy as jnp
from jax import lax
from jax.experimental import pallas as pl
from jax.experimental.pallas import tpu as pltpu


# ------------------------------- Pallas kernel -------------------------------

def pa_kernel(x_ref, wqkv_ref, bqkv_ref, out_ref, attn_ref, q_s, k_s, v_s):
    # x_ref:    (1, N, C)      current batch element (resident across all qi)
    # wqkv_ref: (C, 2*C4 + C)  fused [Wq | Wk | Wv]
    # bqkv_ref: (1, 2*C4 + C)  fused bias (zeros for q/k, bv for v)
    # out_ref:  (1, N, C)      output accumulator block (constant across qi)
    # attn_ref: (1, TN, N)     attention rows for this query tile
    # q_s/k_s/v_s: VMEM scratch holding the full per-batch Q/K/V
    qi = pl.program_id(1)
    TN = attn_ref.shape[1]
    C4 = q_s.shape[1]
    scale = 1.0 / float(np.sqrt(C4))

    @pl.when(qi == 0)
    def _():
        x = x_ref[0]                                                     # (N, C)
        # Single fused QKV projection for the whole batch element (one MXU pass,
        # lane-dense RHS) instead of three separate narrow matmuls.
        qkv = jnp.dot(x, wqkv_ref[...], preferred_element_type=jnp.float32)
        qkv = qkv + bqkv_ref[...]
        q_s[...] = qkv[:, :C4]
        k_s[...] = qkv[:, C4:2 * C4]
        v_s[...] = qkv[:, 2 * C4:]
        out_ref[0] = x                                                   # residual init

    start = pl.multiple_of(qi * TN, TN)
    q_tile = q_s[pl.ds(start, TN), :]                                    # (TN, C4)
    v_tile = v_s[pl.ds(start, TN), :]                                    # (TN, C)
    k_full = k_s[...]                                                    # (N, C4)

    # energy = q_tile @ k_full^T / sqrt(C4)                              # (TN, N)
    energy = lax.dot_general(q_tile, k_full, (((1,), (1,)), ((), ())),
                             preferred_element_type=jnp.float32) * scale

    # softmax over the key axis (last dim)
    m = jnp.max(energy, axis=-1, keepdims=True)
    e = jnp.exp(energy - m)
    s = jnp.sum(e, axis=-1, keepdims=True)
    attn = e * pl.reciprocal(s, approx=False)   # approx=True -> EUP vrcp (looser numerics)
    attn_ref[0] = attn                                                   # lane-dense (TN, N)

    # out[b] += attn^T @ v_tile   (contract the query/tile axis; summed over qi)
    contrib = lax.dot_general(attn, v_tile, (((0,), (0,)), ((), ())),
                              preferred_element_type=jnp.float32)
    out_ref[0] = out_ref[0] + contrib


# --------------------------------- wrapper -----------------------------------

def _pick_query_tile(n, max_tile):
    for t in (512, 256, 128, 64, 32, 16, 8):
        if t <= max_tile and n % t == 0:
            return t
    return n   # fallback: single tile (block dim equals full array dim)


def pa_forward(x, params, *, max_query_tile=128, interpret=False):
    """x: (B, N, C) float32.  Returns (out (B,N,C), attention (B,N,N))."""
    B, N, C = x.shape
    assert C % 4 == 0, "channels must be divisible by 4"
    C4 = C // 4
    DQKV = 2 * C4 + C
    TN = _pick_query_tile(N, max_query_tile)
    n_tiles = N // TN

    # Fused QKV weight/bias (q_conv and k_conv have no bias in the torch module).
    wqkv = jnp.concatenate([params["wq"], params["wk"], params["wv"]], axis=1)   # (C, DQKV)
    bqkv = jnp.concatenate(
        [jnp.zeros((2 * C4,), dtype=x.dtype), params["bv"]])[None, :]            # (1, DQKV)

    out, attn = pl.pallas_call(
        pa_kernel,
        out_shape=(jax.ShapeDtypeStruct((B, N, C), jnp.float32),
                   jax.ShapeDtypeStruct((B, N, N), jnp.float32)),
        grid=(B, n_tiles),
        in_specs=[
            pl.BlockSpec((1, N, C), lambda b, qi: (b, 0, 0)),    # resident across qi
            pl.BlockSpec((C, DQKV), lambda b, qi: (0, 0)),
            pl.BlockSpec((1, DQKV), lambda b, qi: (0, 0)),
        ],
        out_specs=(
            pl.BlockSpec((1, N, C), lambda b, qi: (b, 0, 0)),    # accumulator across qi
            pl.BlockSpec((1, TN, N), lambda b, qi: (b, qi, 0)),  # lane-dense attn rows
        ),
        scratch_shapes=[
            pltpu.VMEM((N, C4), jnp.float32),   # Q
            pltpu.VMEM((N, C4), jnp.float32),   # K
            pltpu.VMEM((N, C), jnp.float32),    # V
        ],
        compiler_params=pltpu.CompilerParams(
            dimension_semantics=("parallel", "arbitrary"),
            vmem_limit_bytes=48 * 1024 * 1024,
        ),
        interpret=interpret,
    )(x, wqkv, bqkv)
    return out, attn


# ----------------------------- pure-JAX reference ----------------------------

def pa_reference(x, params):
    C = x.shape[-1]
    C4 = C // 4
    hp = jax.lax.Precision.HIGHEST
    q = jnp.matmul(x, params["wq"], precision=hp)                  # (B, N, C4)
    k = jnp.matmul(x, params["wk"], precision=hp)                  # (B, N, C4)
    v = jnp.matmul(x, params["wv"], precision=hp) + params["bv"]   # (B, N, C)
    energy = jnp.einsum("bnc,bmc->bnm", q, k, precision=hp) / np.sqrt(C4)
    attn = jax.nn.softmax(energy, axis=-1)
    x_r = jnp.einsum("bqc,bqm->bmc", v, attn, precision=hp)        # torch bmm(x_v, attn)
    return x + x_r, attn


# ------------------------------- params / main --------------------------------

def init_params(key, channels):
    C4 = channels // 4
    k1, k2, k3, k4 = jax.random.split(key, 4)

    def w(kk, shape, scale=0.1):
        return jax.random.normal(kk, shape, jnp.float32) * scale

    # 1x1 Conv1d(cin, cout) == Linear; weights stored pre-transposed as (cin, cout).
    return dict(
        wq=w(k1, (channels, C4)),
        wk=w(k2, (channels, C4)),
        wv=w(k3, (channels, channels)),
        bv=w(k4, (channels,)),
    )


if __name__ == "__main__":
    B, N, C = 2, 256, 128   # small, lane-friendly; 2 query tiles of 128 exercise tiling

    key = jax.random.PRNGKey(0)
    kx, kp = jax.random.split(key)
    x = jax.random.normal(kx, (B, N, C), jnp.float32)
    params = init_params(kp, C)

    out, attn = pa_forward(x, params)
    jax.block_until_ready((out, attn))

    ref_out, ref_attn = pa_reference(x, params)
    np.testing.assert_allclose(np.asarray(attn), np.asarray(ref_attn), atol=1e-3, rtol=1e-3)
    np.testing.assert_allclose(np.asarray(out), np.asarray(ref_out), atol=1e-3, rtol=1e-3)

    print("KERNEL_OK")
</pallas_src>

<mosaic_0001>
module attributes {stable_mosaic.version = 11 : i64} {
  func.func @pa_kernel(%arg0: i32, %arg1: i32, %arg2: memref<1x256x128xf32, #tpu.memory_space<vmem>>, %arg3: memref<128x192xf32, #tpu.memory_space<vmem>>, %arg4: memref<1x192xf32, #tpu.memory_space<vmem>>, %arg5: memref<1x256x128xf32, #tpu.memory_space<vmem>>, %arg6: memref<1x128x256xf32, #tpu.memory_space<vmem>>, %arg7: memref<256x32xf32, #tpu.memory_space<vmem>>, %arg8: memref<256x32xf32, #tpu.memory_space<vmem>>, %arg9: memref<256x128xf32, #tpu.memory_space<vmem>>) attributes {dimension_semantics = [#tpu.dimension_semantics<parallel>, #tpu.dimension_semantics<arbitrary>], iteration_bounds = array<i64: 2, 2>, scalar_prefetch = 0 : i64, scratch_operands = 3 : i64, tpu.core_type = #tpu.core_type<tc>, window_params = [{transform_indices = @transform_0, window_bounds = array<i64: 1, 256, 128>}, {pipeline_mode = #tpu.pipeline_mode<synchronous>, transform_indices = @transform_1, window_bounds = array<i64: 128, 192>}, {pipeline_mode = #tpu.pipeline_mode<synchronous>, transform_indices = @transform_2, window_bounds = array<i64: 1, 192>}, {transform_indices = @transform_3, window_bounds = array<i64: 1, 256, 128>}, {transform_indices = @transform_4, window_bounds = array<i64: 1, 128, 256>}]} {
    %c0_i32 = arith.constant 0 : i32
    %0 = arith.cmpi eq, %arg1, %c0_i32 : i32
    %1 = arith.extui %0 : i1 to i32
    %c0_i32_0 = arith.constant 0 : i32
    %2 = arith.cmpi ne, %1, %c0_i32_0 : i32
    scf.if %2 {
      %c0_17 = arith.constant 0 : index
      %c0_18 = arith.constant 0 : index
      %c0_19 = arith.constant 0 : index
      %33 = vector.load %arg2[%c0_17, %c0_18, %c0_19] : memref<1x256x128xf32, #tpu.memory_space<vmem>>, vector<1x256x128xf32>
      %34 = vector.shape_cast %33 : vector<1x256x128xf32> to vector<256x128xf32>
      %c0_20 = arith.constant 0 : index
      %c0_21 = arith.constant 0 : index
      %35 = vector.load %arg3[%c0_20, %c0_21] : memref<128x192xf32, #tpu.memory_space<vmem>>, vector<128x192xf32>
      %cst_22 = arith.constant dense<0.000000e+00> : vector<256x192xf32>
      %36 = tpu.matmul %34, %35, %cst_22 {dimension_numbers = #tpu.dot_dimension_numbers<[1], [0], [0], [1], [0, 0, 1, 1], [], []>} : vector<256x128xf32>, vector<128x192xf32>, vector<256x192xf32> -> vector<256x192xf32>
      %c0_23 = arith.constant 0 : index
      %c0_24 = arith.constant 0 : index
      %37 = vector.load %arg4[%c0_23, %c0_24] : memref<1x192xf32, #tpu.memory_space<vmem>>, vector<1x192xf32>
      %38 = vector.broadcast %37 : vector<1x192xf32> to vector<256x192xf32>
      %39 = arith.addf %36, %38 : vector<256x192xf32>
      %40 = vector.extract_strided_slice %39 {offsets = [0, 0], sizes = [256, 32], strides = [1, 1]} : vector<256x192xf32> to vector<256x32xf32>
      %c0_25 = arith.constant 0 : index
      %c0_26 = arith.constant 0 : index
      %41 = vector.load %arg7[%c0_25, %c0_26] : memref<256x32xf32, #tpu.memory_space<vmem>>, vector<256x32xf32>
      tpu.vector_store %arg7[%c0_25, %c0_26], %40 {strides = array<i32>} : memref<256x32xf32, #tpu.memory_space<vmem>>, vector<256x32xf32>,
      %42 = vector.extract_strided_slice %39 {offsets = [0, 32], sizes = [256, 32], strides = [1, 1]} : vector<256x192xf32> to vector<256x32xf32>
      %c0_27 = arith.constant 0 : index
      %c0_28 = arith.constant 0 : index
      %43 = vector.load %arg8[%c0_27, %c0_28] : memref<256x32xf32, #tpu.memory_space<vmem>>, vector<256x32xf32>
      tpu.vector_store %arg8[%c0_27, %c0_28], %42 {strides = array<i32>} : memref<256x32xf32, #tpu.memory_space<vmem>>, vector<256x32xf32>,
      %44 = vector.extract_strided_slice %39 {offsets = [0, 64], sizes = [256, 128], strides = [1, 1]} : vector<256x192xf32> to vector<256x128xf32>
      %c0_29 = arith.constant 0 : index
      %c0_30 = arith.constant 0 : index
      %45 = vector.load %arg9[%c0_29, %c0_30] : memref<256x128xf32, #tpu.memory_space<vmem>>, vector<256x128xf32>
      tpu.vector_store %arg9[%c0_29, %c0_30], %44 {strides = array<i32>} : memref<256x128xf32, #tpu.memory_space<vmem>>, vector<256x128xf32>,
      %c0_31 = arith.constant 0 : index
      %c0_32 = arith.constant 0 : index
      %c0_33 = arith.constant 0 : index
      %46 = vector.load %arg5[%c0_31, %c0_32, %c0_33] : memref<1x256x128xf32, #tpu.memory_space<vmem>>, vector<1x256x128xf32>
      %47 = vector.shape_cast %46 : vector<1x256x128xf32> to vector<256x128xf32>
      %48 = vector.shape_cast %34 : vector<256x128xf32> to vector<1x256x128xf32>
      tpu.vector_store %arg5[%c0_31, %c0_32, %c0_33], %48 {strides = array<i32>} : memref<1x256x128xf32, #tpu.memory_space<vmem>>, vector<1x256x128xf32>,
    } else {
    }
    %c128_i32 = arith.constant 128 : i32
    %3 = arith.muli %arg1, %c128_i32 : i32
    %4 = tpu.assume_multiple %3, 128 : i32
    %5 = arith.index_cast %4 : i32 to index
    %c0 = arith.constant 0 : index
    %6 = vector.load %arg7[%5, %c0] : memref<256x32xf32, #tpu.memory_space<vmem>>, vector<128x32xf32>
    %7 = arith.index_cast %4 : i32 to index
    %c0_1 = arith.constant 0 : index
    %8 = vector.load %arg9[%7, %c0_1] : memref<256x128xf32, #tpu.memory_space<vmem>>, vector<128x128xf32>
    %c0_2 = arith.constant 0 : index
    %c0_3 = arith.constant 0 : index
    %9 = vector.load %arg8[%c0_2, %c0_3] : memref<256x32xf32, #tpu.memory_space<vmem>>, vector<256x32xf32>
    %cst = arith.constant dense<0.000000e+00> : vector<128x256xf32>
    %10 = tpu.matmul %6, %9, %cst {dimension_numbers = #tpu.dot_dimension_numbers<[1], [1], [0], [0], [0, 0, 1, 0], [], []>} : vector<128x32xf32>, vector<256x32xf32>, vector<128x256xf32> -> vector<128x256xf32>
    %cst_4 = arith.constant 0.176776692 : f32
    %11 = vector.broadcast %cst_4 : f32 to vector<128x256xf32>
    %12 = arith.mulf %10, %11 : vector<128x256xf32>
    %cst_5 = arith.constant dense<0xFF800000> : vector<128xf32>
    %13 = vector.multi_reduction <maximumf>, %12, %cst_5 [1] : vector<128x256xf32> to vector<128xf32>
    %14 = vector.shape_cast %13 : vector<128xf32> to vector<128x1xf32>
    %15 = vector.broadcast %14 : vector<128x1xf32> to vector<128x256xf32>
    %16 = arith.subf %12, %15 : vector<128x256xf32>
    %17 = math.exp %16 : vector<128x256xf32>
    %cst_6 = arith.constant dense<0.000000e+00> : vector<128xf32>
    %18 = vector.multi_reduction <add>, %17, %cst_6 [1] : vector<128x256xf32> to vector<128xf32>
    %19 = vector.shape_cast %18 : vector<128xf32> to vector<128x1xf32>
    %20 = tpu.reciprocal %19 : vector<128x1xf32> -> vector<128x1xf32>
    %21 = vector.broadcast %20 : vector<128x1xf32> to vector<128x256xf32>
    %22 = arith.mulf %17, %21 : vector<128x256xf32>
    %c0_7 = arith.constant 0 : index
    %c0_8 = arith.constant 0 : index
    %c0_9 = arith.constant 0 : index
    %23 = vector.load %arg6[%c0_7, %c0_8, %c0_9] : memref<1x128x256xf32, #tpu.memory_space<vmem>>, vector<1x128x256xf32>
    %24 = vector.shape_cast %23 : vector<1x128x256xf32> to vector<128x256xf32>
    %25 = vector.shape_cast %22 : vector<128x256xf32> to vector<1x128x256xf32>
    tpu.vector_store %arg6[%c0_7, %c0_8, %c0_9], %25 {strides = array<i32>} : memref<1x128x256xf32, #tpu.memory_space<vmem>>, vector<1x128x256xf32>,
    %cst_10 = arith.constant dense<0.000000e+00> : vector<256x128xf32>
    %26 = tpu.matmul %22, %8, %cst_10 {dimension_numbers = #tpu.dot_dimension_numbers<[0], [0], [1], [1], [0, 1, 1, 1], [], []>} : vector<128x256xf32>, vector<128x128xf32>, vector<256x128xf32> -> vector<256x128xf32>
    %c0_11 = arith.constant 0 : index
    %c0_12 = arith.constant 0 : index
    %c0_13 = arith.constant 0 : index
    %27 = vector.load %arg5[%c0_11, %c0_12, %c0_13] : memref<1x256x128xf32, #tpu.memory_space<vmem>>, vector<1x256x128xf32>
    %28 = vector.shape_cast %27 : vector<1x256x128xf32> to vector<256x128xf32>
    %29 = arith.addf %28, %26 : vector<256x128xf32>
    %c0_14 = arith.constant 0 : index
    %c0_15 = arith.constant 0 : index
    %c0_16 = arith.constant 0 : index
    %30 = vector.load %arg5[%c0_14, %c0_15, %c0_16] : memref<1x256x128xf32, #tpu.memory_space<vmem>>, vector<1x256x128xf32>
    %31 = vector.shape_cast %30 : vector<1x256x128xf32> to vector<256x128xf32>
    %32 = vector.shape_cast %29 : vector<256x128xf32> to vector<1x256x128xf32>
    tpu.vector_store %arg5[%c0_14, %c0_15, %c0_16], %32 {strides = array<i32>} : memref<1x256x128xf32, #tpu.memory_space<vmem>>, vector<1x256x128xf32>,
    return
  }
  func.func @transform_0(%arg0: i32, %arg1: i32) -> (i32, i32, i32) {
    %c0_i32 = arith.constant 0 : i32
    %c0_i32_0 = arith.constant 0 : i32
    %c0_i32_1 = arith.constant 0 : i32
    return %arg0, %c0_i32, %c0_i32_0 : i32, i32, i32
  }
  func.func @transform_1(%arg0: i32, %arg1: i32) -> (i32, i32) {
    %c0_i32 = arith.constant 0 : i32
    %c0_i32_0 = arith.constant 0 : i32
    %c0_i32_1 = arith.constant 0 : i32
    return %c0_i32, %c0_i32_0 : i32, i32
  }
  func.func @transform_2(%arg0: i32, %arg1: i32) -> (i32, i32) {
    %c0_i32 = arith.constant 0 : i32
    %c0_i32_0 = arith.constant 0 : i32
    %c0_i32_1 = arith.constant 0 : i32
    return %c0_i32, %c0_i32_0 : i32, i32
  }
  func.func @transform_3(%arg0: i32, %arg1: i32) -> (i32, i32, i32) {
    %c0_i32 = arith.constant 0 : i32
    %c0_i32_0 = arith.constant 0 : i32
    %c0_i32_1 = arith.constant 0 : i32
    return %arg0, %c0_i32, %c0_i32_0 : i32, i32, i32
  }
  func.func @transform_4(%arg0: i32, %arg1: i32) -> (i32, i32, i32) {
    %c0_i32 = arith.constant 0 : i32
    %c0_i32_0 = arith.constant 0 : i32
    return %arg0, %arg1, %c0_i32 : i32, i32, i32
  }
}

</mosaic_0001>

<bundles_post_ra>
// kernel: tpu_custom_call.1
= control target key start
LH: loop header
LB: loop body
LE: loop exit
PB: predicated region body
PF: predicated region fallthrough
CT: control target
= control target key end

     0   :  { %s4678_s0 = inlined_call_operand.hbm [shape: f32[2,256,128], index: 0, kind: input, shape index: {}]   ;;  %s4679_s1 = inlined_call_operand.vmem [shape: f32[128,192], index: 1, kind: input, shape index: {}]   ;;  %s4680_s2 = inlined_call_operand.vmem [shape: f32[1,192], index: 2, kind: input, shape index: {}]   ;;  %s4681_s3 = inlined_call_operand.hbm [shape: f32[2,256,128], index: 3, kind: output, shape index: {0}]   ;;  %s4682_s4 = inlined_call_operand.hbm [shape: f32[2,256,256], index: 4, kind: output, shape index: {1}]  }
   0x1   :  { %4692 = sst [smem:[#allocation21_spill]] %s4678_s0 }
   0x2   :  { %10 = vsyncpa [#allocation6], 0 }
   0x3   :  { %12 = vsyncpa [#allocation6 + $0x1], 0 }
   0x4   :  { %13 = vsyncpa [#allocation7], 0 }
   0x5   :  { %15 = vsyncpa [#allocation7 + $0x1], 0 }
   0x6   :  { %16 = vsyncpa [#allocation10], 0 }
   0x7   :  { %18 = vsyncpa [#allocation10 + $0x1], 0  ;;  %s3113_s15 = smov 0   ;;  %s3115_s16 = smov 0  }
   0x8   :  { %s3117_s17 = smov 0   ;;  %s3119_s18 = smov 0  }
   0x9   :  { %s3121_s19 = smov 0   ;;  %s3123_s20 = smov 0  }
   0xa   :  { %s3125_s21 = smov 0   ;;  %s3127_s22 = smov 0  }
   0xb   :  { %s3129_s23 = smov 0   ;;  %s3131_s24 = smov 0  }
   0xc   :  { %s3133_s25 = smov 0  }
   0xd LB: > { %4693 = sst [smem:[#allocation14_spill]] %s3054_s20  ;;  %s2284_s26 = sadd.s32 4294967295, %s3074_s25   ;;  %s3074_s25 = sphi %s3133_s25, %s24_s25   ;;  %s3070_s24 = sphi %s3131_s24, %s4724_s24   ;;  %s3066_s23 = sphi %s3129_s23, %s4723_s23   ;;  %s3062_s22 = sphi %s3127_s22, %s4722_s22   ;;  %s3058_s21 = sphi %s3125_s21, %s4721_s21   ;;  %s3054_s20 = sphi %s3123_s20, %s4720_s20   ;;  %s3050_s19 = sphi %s3121_s19, %s4729_s19   ;;  %s3046_s18 = sphi %s3119_s18, %s4728_s18   ;;  %s3042_s17 = sphi %s3117_s17, %s4727_s17   ;;  %s3038_s16 = sphi %s3115_s16, %s4726_s16   ;;  %s3034_s15 = sphi %s3113_s15, %s4725_s15  }
   0xe   : > { %4694 = sst [smem:[#allocation15_spill]] %s3066_s23  ;;  %s2285_s27 = sadd.s32 4294967294, %s3074_s25  }
   0xf   : > { %4695 = sst [smem:[#allocation16_spill]] %s3070_s24  ;;  %s33_s28 = sadd.s32 1, %s3066_s23 }
  0x10   : > { %s36_s29 = sadd.s32 1, %s3070_s24  ;;  %p34_p0 = scmp.ge.s32.totalorder %s33_s28, 2 }
  0x11   : > { %s43_s30 = sadd.s32 1, %s3054_s20  ;;  %p50_p1 = scmp.ne.s32.totalorder %s3054_s20, %s3050_s19 }
  0x12   : > { %p51_p2 = scmp.eq.s32.totalorder %s3074_s25, 0  ;;  %s4731_s28 = smov (%p34_p0, %s33_s28), 0 }
  0x13   : > { %4696 = sst [smem:[#allocation17_spill]] %s4731_s28  ;;  %s4733_s29 = smov (!%p34_p0, %s36_s29), %s3070_s24 }
  0x14   : > { %p3179_p3 = por %p51_p2, %p50_p1  ;;  %p56_p4 = scmp.ne.s32.totalorder %s3050_s19, %s3046_s18 }
  0x15   : > { %p38_p5 = scmp.ge.s32.totalorder %s4733_s29, 2  ;;  %p57_p6 = scmp.eq.s32.totalorder %s2284_s26, 0 }
  0x16   : > { %p3185_p7 = scmp.eq.s32.totalorder %s2284_s26, 3  ;;  %p3189_p8 = scmp.eq.s32.totalorder %s2285_s27, 3 }
  0x17   : > { %s4735_s29 = smov (%p38_p5, %s4733_s29), 0  ;;  %p3195_p9 = por %p57_p6, %p56_p4 }
  0x18   : > { %4700 = sst [smem:[#allocation18_spill]] %s4735_s29  ;;  %p3201_p10 = por %p3185_p7, %p50_p1 }
  0x19   : > { %s40_s10 = ssub.s32 %s3070_s24, %s4735_s29  ;;  %p3209_p11 = por %p3189_p8, %p56_p4 }
  0x1a   : > { %s4702_s9 = scalar_select %p3201_p10, 1, 0 }
  0x1b   : > { %s4703_s11 = scalar_select %p3209_p11, 1, 0 }
  0x1c   : > { %p41_p12 = scmp.eq.s32.totalorder %s40_s10, 0  ;;  %s135_s12 = ssub.s32 %s3066_s23, %s4731_s28 }
  0x1d   : > { %4704 = sst [smem:[#allocation19_spill]] %s4703_s11  ;;  %s136_s13 = sor.u32 %s135_s12, %s40_s10 }
  0x1e   : > { %s139_s14 = sadd.s32 1, %s3042_s17  ;;  %p137_p13 = scmp.eq.s32.totalorder %s136_s13, 0 }
  0x1f   : > { %s3217_s26 = scalar_select %p41_p12, %s3054_s20, %s43_s30  }
  0x20   : > { %p149_p0 = scmp.ne.s32.totalorder %s3042_s17, %s3038_s16  ;;  %p155_p1 = scmp.ne.s32.totalorder %s3038_s16, %s3034_s15 }
  0x21   : > { %4705 = sst [smem:[#allocation20_spill]] %s3217_s26  ;;  %p2695_p5 = scmp.lt.s32.totalorder %s3074_s25, 4 }
  0x22   : > { %s3224_s27 = scalar_select %p137_p13, %s3042_s17, %s139_s14  }
  0x23   : > { %p3228_p2 = por %p149_p0, %p3185_p7  ;;  %p3234_p4 = por %p155_p1, %p3189_p8 }
  0x24   : > { %s182_s10 = sand.u32 1, %s3054_s20   ;;  %s2355_s12 = sshll.u32 %s3070_s24, 12 }
  0x25   : > { %s4706_s29 = scalar_select %p3228_p2, 1, 0 }
  0x26   : > { %s4707_s11 = scalar_select %p3234_p4, 1, 0 }
  0x27   : > { %s2288_s30 = sshll.u32 %s182_s10, 8  ;;  %s4708_s0 = sld [smem:[#allocation21_spill]] }
  0x28   : > { %s186_s6 = scalar_lea.vmem [#allocation5], %s2288_s30  ;;  %p3250_p6 = pnand %p2695_p5, %p3179_p3 }
  0x29   : > { %s193_s14 = sshll.u32 %s186_s6, 4  ;;  %s3255_s24 = scalar_lea.sflag [#allocation6], %s182_s10  ;;  %s3246_s14 = int_to_ptr.vmem [resolvable:$true] %s193_s14 }
  0x2a   : > { %p2892_p12 = pneg %p3250_p6 }
  0x2d   : > { %s3244_s23 = scalar_lea.hbm %s4708_s0, %s2355_s12  ;;  %s2895_s5 = scalar_lea.hbm %s4708_s0, 8192 }
  0x2e   : > { %s2890_s28 = scalar_lea.hbm %s3244_s23, 4096  ;;  %p2896_p3 = scmp.lt.u32.totalorder %s3244_s23, %s4708_s0 }
  0x2f   : > { %p2891_p8 = scmp.ne.s32.totalorder %s3244_s23, %s2890_s28  ;;  %p2897_p1 = scmp.lt.u32.totalorder %s2895_s5, %s2890_s28 }
  0x30   : > { %p2899_p7 = scmp.lt.u32.totalorder %s2890_s28, %s3244_s23 }
  0x31   : > { %p2893_p13 = pnand %p2892_p12, %p2891_p8  ;;  %p2898_p5 = por %p2897_p1, %p2896_p3 }
  0x33   : > { %p2894_p0 = pneg %p2893_p13  ;;  %p2900_p4 = por %p2899_p7, %p2898_p5 }
  0x35   : > { %p2901_p11 = pnand %p2900_p4, %p2894_p0 }
  0x37   : > { %2904 = shalt.err (!%p2901_p11)
}
  0x38   : > { %s2905_s10 = scalar_lea.vmem %s3246_s14, 4096  ;;  %s3076_s30 = smov [#allocation5]  }
  0x39   : > { %p2906_p8 = scmp.ne.s32.totalorder %s3246_s14, %s2905_s10  ;;  %s2910_s12 = sshll.u32 %s3076_s30, 4  ;;  %s2911_s12 = int_to_ptr.vmem [resolvable:$false] %s2910_s12 }
  0x3a   : > { %s2912_s13 = scalar_lea.vmem %s2911_s12, 8192  ;;  %p2913_p2 = scmp.lt.s32.totalorder %s3246_s14, %s2911_s12 }
  0x3b   : > { %p2908_p13 = pnand %p2906_p8, %p2892_p12  ;;  %p2914_p3 = scmp.lt.s32.totalorder %s2912_s13, %s2905_s10 }
  0x3d   : > { %p2909_p10 = pneg %p2908_p13  ;;  %p2915_p1 = por %p2914_p3, %p2913_p2 }
  0x3f   : > { %p2916_p7 = pnand %p2915_p1, %p2909_p10 }
  0x41   : > { %2919 = shalt.err (!%p2916_p7)
}
  0x42   : > { %s3077_s28 = smov 128   ;;  %s3078_s5 = smov 8  }
  0x43   : > { %2687 = dma.hbm_to_vmem [thread:$0]  (!%p3250_p6), %s3244_s23, 4096, %s3246_s14, %s3255_s24, %s3077_s28, %s3077_s28, %s3078_s5  }
  0x44   : > { %p201_p11 = scmp.lt.s32.totalorder %s3074_s25, 5  ;;  %p4710_p4 = scmp.ge.s32.totalorder %s3074_s25, 1 }
  0x46   : > { %p202_p12 = pnand %p4710_p4, %p201_p11 }
  0x47   : > { %s3287_s6 = sand.u32 (!%p202_p12), 1, %s3050_s19  }
  0x48   : > { %205 = sbr.rel (%p202_p12) target bundleno = 1687 (0x697), region = 32  ;;  %s2292_s10 = sshll.u32 (!%p202_p12), %s3287_s6, 8 }
  0x49   : > { %s208_s30 = scalar_lea.sflag (!%p202_p12), [#allocation6], %s3287_s6  ;;  %s3291_s12 = scalar_lea.vmem (!%p202_p12), [#allocation5], %s2292_s10 }
  0x4f   : > { %3021 = dma.done.wait (%p3195_p9), %s208_s30, 4096  }
  0x50   : > { %3023 = vsyncadd (%p3195_p9), %s208_s30, 4294963200  ;;  %s4690_s23 = sand.u32 1, %s3038_s16   ;;  %s3300_s14 = scalar_lea.vmem [#allocation8], %s2292_s10 }
  0x51   : > { %s2294_s24 = sshll.u32 %s4690_s23, 8  ;;  %p2295_p10 = scmp.ne.s32.totalorder %s3058_s21, 0 }
  0x52   : > { %s3302_s7 = scalar_lea.vmem [#allocation9], %s2294_s24  ;;  %v279_v0 = vld [vmem:[%s4679_s1 + $0x8] sm:$0xff] (!%p2295_p10)  ;;  %v281_v1 = vld [vmem:[%s4679_s1 + $0x18] sm:$0xff] (!%p2295_p10)  ;;  %v278_v2 = vld [vmem:[%s4679_s1] sm:$0xff] (!%p2295_p10)  ;;  %v3079_v7 = vmov (!%p2295_p10), 0.0   ;;  %vm579_vm0 = vcmask (!%p2295_p10), 261120  }
  0x53   : > { %245 = sbr.rel (%p2295_p10) target bundleno = 637 (0x27d), region = 40  ;;  %v2550_v3 = vpack.c.bf16 (!%p2295_p10), %v281_v1, %v279_v0  ;;  %v280_v4 = vld [vmem:[%s4679_s1 + $0x10] sm:$0xff] (!%p2295_p10)  ;;  %v283_v5 = vld [vmem:[%s4679_s1 + $0x28] sm:$0xff] (!%p2295_p10)  ;;  %v285_v6 = vld [vmem:[%s4679_s1 + $0x38] sm:$0xff] (!%p2295_p10)  ;;  %386 = vmatprep.mubr.f32.mxu0 (!%p2295_p10), %v3079_v7  ;;  %482 = vmatprep.mubr.f32.mxu1 (!%p2295_p10), %v3079_v7  ;;  %s3080_s24 = smov (!%p2295_p10), 96   ;;  %vm932_vm1 = vcmask (!%p2295_p10), 523264  }
  0x54   : > { %v2552_v8 = vpack.c.bf16 (!%p2295_p10), %v280_v4, %v278_v2  ;;  %v2554_v9 = vpack.c.bf16 (!%p2295_p10), %v285_v6, %v283_v5  ;;  %v282_v10 = vld [vmem:[%s4679_s1 + $0x20] sm:$0xff] (!%p2295_p10)  ;;  %v284_v11 = vld [vmem:[%s4679_s1 + $0x30] sm:$0xff] (!%p2295_p10)  ;;  %v287_v12 = vld [vmem:[%s4679_s1 + $0x48] sm:$0xff] (!%p2295_p10)  ;;  %s3081_s13 = smov (!%p2295_p10), 64  }
  0x55   : > { %2551 = vmatprep.subr.bf16.mxu0 (!%p2295_p10), %v2550_v3  ;;  %2662 = vmatprep.subr.bf16.mxu1 (!%p2295_p10), %v2550_v3  ;;  %v289_v13 = vld [vmem:[%s4679_s1 + $0x58] sm:$0xff] (!%p2295_p10)  ;;  %v2556_v14 = vpack.c.bf16 (!%p2295_p10), %v284_v11, %v282_v10  ;;  %v286_v16 = vld [vmem:[%s4679_s1 + $0x40] sm:$0xff] (!%p2295_p10)  ;;  %v288_v17 = vld [vmem:[%s4679_s1 + $0x50] sm:$0xff] (!%p2295_p10) }
  0x56   : > { %2553 = vmatpush1.bf16.msra.mxu0 (!%p2295_p10), %v2552_v8  ;;  %2670 = vmatpush1.bf16.msra.mxu1 (!%p2295_p10), %v2552_v8  ;;  %v2558_v15 = vpack.c.bf16 (!%p2295_p10), %v289_v13, %v287_v12  ;;  %v291_v18 = vld [vmem:[%s4679_s1 + $0x68] sm:$0xff] (!%p2295_p10)  ;;  %v293_v19 = vld [vmem:[%s4679_s1 + $0x78] sm:$0xff] (!%p2295_p10)  ;;  %v2560_v20 = vpack.c.bf16 (!%p2295_p10), %v288_v17, %v286_v16  ;;  %v290_v22 = vld [vmem:[%s4679_s1 + $0x60] sm:$0xff] (!%p2295_p10) }
  0x57   : > { %2555 = vmatprep.subr.bf16.mxu0 (!%p2295_p10), %v2554_v9  ;;  %2663 = vmatprep.subr.bf16.mxu1 (!%p2295_p10), %v2554_v9  ;;  %v2562_v21 = vpack.c.bf16 (!%p2295_p10), %v293_v19, %v291_v18  ;;  %v292_v23 = vld [vmem:[%s4679_s1 + $0x70] sm:$0xff] (!%p2295_p10)  ;;  %v295_v24 = vld [vmem:[%s4679_s1 + $0x88] sm:$0xff] (!%p2295_p10)  ;;  %v297_v25 = vld [vmem:[%s4679_s1 + $0x98] sm:$0xff] (!%p2295_p10)  ;;  %v312_v18 = vlaneseq (!%p2295_p10) }
  0x58   : > { %v3362_v26 = vld [vmem:[%s3291_s12] sm:$0xff] (!%p2295_p10)  ;;  %v296_v28 = vld [vmem:[%s4679_s1 + $0x90] sm:$0xff] (!%p2295_p10)  ;;  %v3376_v30 = vld [vmem:[%s3291_s12 + $0x88] sm:$0xff] (!%p2295_p10)  ;;  %v2564_v32 = vpack.c.bf16 (!%p2295_p10), %v292_v23, %v290_v22  ;;  %v2566_v38 = vpack.c.bf16 (!%p2295_p10), %v297_v25, %v295_v24 }
  0x59   : > { %v294_v27 = vld [vmem:[%s4679_s1 + $0x80] sm:$0xff] (!%p2295_p10)  ;;  %1029 = vst [vmem:[%s3300_s14] sm:$0xff] (!%p2295_p10), %v3362_v26  ;;  %v3379_v31 = vld [vmem:[%s3291_s12 + $0x8] sm:$0xff] (!%p2295_p10)  ;;  %v301_v34 = vld [vmem:[%s4679_s1 + $0xb8] sm:$0xff] (!%p2295_p10)  ;;  %v313_v19 = vshrl.u32 (!%p2295_p10), %v312_v18, 7 }
  0x5a   : > { %2557 = vmatpush1.bf16.msra.mxu0 %v2556_v14  ;;  %2671 = vmatpush1.bf16.msra.mxu1 %v2556_v14  ;;  %v3373_v29 = vld [vmem:[%s3291_s12 + $0x80] sm:$0xff]  ;;  %v299_v33 = vld [vmem:[%s4679_s1 + $0xa8] sm:$0xff]  ;;  %1046 = vst [vmem:[%s3300_s14 + $0x88] sm:$0xff] %v3376_v30  ;;  %1030 = vst [vmem:[%s3300_s14 + $0x8] sm:$0xff] %v3379_v31  ;;  %v2568_v50 = vpack.c.bf16 %v296_v28, %v294_v27 }
  0x5b   : > { %2559 = vmatprep.subr.bf16.mxu0 %v2558_v15  ;;  %2664 = vmatprep.subr.bf16.mxu1 %v2558_v15  ;;  %1045 = vst [vmem:[%s3300_s14 + $0x80] sm:$0xff] %v3373_v29  ;;  %v3394_v35 = vld [vmem:[%s3291_s12 + $0x10] sm:$0xff]  ;;  %v3400_v37 = vld [vmem:[%s3291_s12 + $0x18] sm:$0xff]  ;;  %v3412_v40 = vld [vmem:[%s3291_s12 + $0x20] sm:$0xff]  ;;  %v2570_v56 = vpack.c.bf16 %v301_v34, %v299_v33  ;;  %v318_v22 = vsub.s32 1, %v313_v19 }
  0x5c   : > { %v3397_v36 = vld [vmem:[%s3291_s12 + $0x90] sm:$0xff]  ;;  %1031 = vst [vmem:[%s3300_s14 + $0x10] sm:$0xff] %v3394_v35  ;;  %1032 = vst [vmem:[%s3300_s14 + $0x18] sm:$0xff] %v3400_v37  ;;  %v3409_v39 = vld [vmem:[%s3291_s12 + $0x98] sm:$0xff] }
  0x5d   : > { %1047 = vst [vmem:[%s3300_s14 + $0x90] sm:$0xff] %v3397_v36  ;;  %v3415_v41 = vld [vmem:[%s3291_s12 + $0xa0] sm:$0xff]  ;;  %1048 = vst [vmem:[%s3300_s14 + $0x98] sm:$0xff] %v3409_v39  ;;  %v3424_v42 = vld [vmem:[%s3291_s12 + $0x28] sm:$0xff] }
  0x5e   : > { %2561 = vmatpush1.bf16.msra.mxu0 %v2560_v20  ;;  %2672 = vmatpush1.bf16.msra.mxu1 %v2560_v20  ;;  %1033 = vst [vmem:[%s3300_s14 + $0x20] sm:$0xff] %v3412_v40  ;;  %1049 = vst [vmem:[%s3300_s14 + $0xa0] sm:$0xff] %v3415_v41  ;;  %v3427_v43 = vld [vmem:[%s3291_s12 + $0xa8] sm:$0xff]  ;;  %v3430_v44 = vld [vmem:[%s3291_s12 + $0x30] sm:$0xff]  ;;  %v314_v20 = vsub.s32 0, %v313_v19 }
  0x5f   : > { %2563 = vmatprep.subr.bf16.mxu0 %v2562_v21  ;;  %2665 = vmatprep.subr.bf16.mxu1 %v2562_v21  ;;  %v298_v45 = vld [vmem:[%s4679_s1 + $0xa0] sm:$0xff]  ;;  %v300_v46 = vld [vmem:[%s4679_s1 + $0xb0] sm:$0xff]  ;;  %1034 = vst [vmem:[%s3300_s14 + $0x28] sm:$0xff] %v3424_v42  ;;  %1050 = vst [vmem:[%s3300_s14 + $0xa8] sm:$0xff] %v3427_v43 }
  0x60   : > { %1035 = vst [vmem:[%s3300_s14 + $0x30] sm:$0xff] %v3430_v44  ;;  %v3445_v47 = vld [vmem:[%s3291_s12 + $0xb0] sm:$0xff]  ;;  %v3448_v48 = vld [vmem:[%s3291_s12 + $0x38] sm:$0xff]  ;;  %v303_v51 = vld [vmem:[%s4679_s1 + $0xc8] sm:$0xff]  ;;  %v2572_v2 = vpack.c.bf16 %v300_v46, %v298_v45 }
  0x61   : > { %v3451_v49 = vld [vmem:[%s3291_s12 + $0xb8] sm:$0xff]  ;;  %1051 = vst [vmem:[%s3300_s14 + $0xb0] sm:$0xff] %v3445_v47  ;;  %1036 = vst [vmem:[%s3300_s14 + $0x38] sm:$0xff] %v3448_v48  ;;  %v3466_v53 = vld [vmem:[%s3291_s12 + $0x40] sm:$0xff] }
  0x62   : > { %2565 = vmatpush1.bf16.msra.mxu0 %v2564_v32  ;;  %2673 = vmatpush1.bf16.msra.mxu1 %v2564_v32  ;;  %v305_v52 = vld [vmem:[%s4679_s1 + $0xd8] sm:$0xff]  ;;  %1052 = vst [vmem:[%s3300_s14 + $0xb8] sm:$0xff] %v3451_v49  ;;  %v3469_v54 = vld [vmem:[%s3291_s12 + $0xc0] sm:$0xff]  ;;  %v3472_v55 = vld [vmem:[%s3291_s12 + $0x48] sm:$0xff] }
  0x63   : > { %2567 = vmatprep.subr.bf16.mxu0 %v2566_v38  ;;  %2666 = vmatprep.subr.bf16.mxu1 %v2566_v38  ;;  %1037 = vst [vmem:[%s3300_s14 + $0x40] sm:$0xff] %v3466_v53  ;;  %1053 = vst [vmem:[%s3300_s14 + $0xc0] sm:$0xff] %v3469_v54  ;;  %v3481_v57 = vld [vmem:[%s3291_s12 + $0xc8] sm:$0xff]  ;;  %v3484_v58 = vld [vmem:[%s3291_s12 + $0x50] sm:$0xff]  ;;  %v2574_v6 = vpack.c.bf16 %v305_v52, %v303_v51 }
  0x64   : > { %1038 = vst [vmem:[%s3300_s14 + $0x48] sm:$0xff] %v3472_v55  ;;  %v3487_v59 = vld [vmem:[%s3291_s12 + $0xd0] sm:$0xff]  ;;  %1054 = vst [vmem:[%s3300_s14 + $0xc8] sm:$0xff] %v3481_v57  ;;  %v3496_v60 = vld [vmem:[%s3291_s12 + $0x58] sm:$0xff] }
  0x65   : > { %1039 = vst [vmem:[%s3300_s14 + $0x50] sm:$0xff] %v3484_v58  ;;  %1055 = vst [vmem:[%s3300_s14 + $0xd0] sm:$0xff] %v3487_v59  ;;  %v3499_v61 = vld [vmem:[%s3291_s12 + $0xd8] sm:$0xff]  ;;  %v3502_v62 = vld [vmem:[%s3291_s12 + $0x60] sm:$0xff] }
  0x66   : > { %1040 = vst [vmem:[%s3300_s14 + $0x58] sm:$0xff] %v3496_v60  ;;  %1056 = vst [vmem:[%s3300_s14 + $0xd8] sm:$0xff] %v3499_v61  ;;  %v3511_v63 = vld [vmem:[%s3291_s12 + $0xe0] sm:$0xff]  ;;  %v3514_v0 = vld [vmem:[%s3291_s12 + $0x68] sm:$0xff]  ;;  %2569 = vmatpush1.bf16.msra.mxu0 %v2568_v50  ;;  %2674 = vmatpush1.bf16.msra.mxu1 %v2568_v50 }
  0x67   : > { %1041 = vst [vmem:[%s3300_s14 + $0x60] sm:$0xff] %v3502_v62  ;;  %v3517_v1 = vld [vmem:[%s3291_s12 + $0xe8] sm:$0xff]  ;;  %1057 = vst [vmem:[%s3300_s14 + $0xe0] sm:$0xff] %v3511_v63  ;;  %v3526_v3 = vld [vmem:[%s3291_s12 + $0x70] sm:$0xff]  ;;  %2571 = vmatprep.subr.bf16.mxu0 %v2570_v56  ;;  %2667 = vmatprep.subr.bf16.mxu1 %v2570_v56 }
  0x68   : > { %1042 = vst [vmem:[%s3300_s14 + $0x68] sm:$0xff] %v3514_v0  ;;  %1058 = vst [vmem:[%s3300_s14 + $0xe8] sm:$0xff] %v3517_v1  ;;  %v3529_v4 = vld [vmem:[%s3291_s12 + $0xf0] sm:$0xff]  ;;  %v3532_v5 = vld [vmem:[%s3291_s12 + $0x78] sm:$0xff] }
  0x69   : > { %v302_v8 = vld [vmem:[%s4679_s1 + $0xc0] sm:$0xff]  ;;  %v304_v9 = vld [vmem:[%s4679_s1 + $0xd0] sm:$0xff]  ;;  %1043 = vst [vmem:[%s3300_s14 + $0x70] sm:$0xff] %v3526_v3  ;;  %1059 = vst [vmem:[%s3300_s14 + $0xf0] sm:$0xff] %v3529_v4 }
  0x6a   : > { %1044 = vst [vmem:[%s3300_s14 + $0x78] sm:$0xff] %v3532_v5  ;;  %v3547_v10 = vld [vmem:[%s3291_s12 + $0xf8] sm:$0xff]  ;;  %v307_v11 = vld [vmem:[%s4679_s1 + $0xe8] sm:$0xff]  ;;  %2573 = vmatpush1.bf16.msra.mxu0 %v2572_v2  ;;  %2675 = vmatpush1.bf16.msra.mxu1 %v2572_v2  ;;  %v2576_v13 = vpack.c.bf16 %v304_v9, %v302_v8  ;;  %v306_v15 = vld [vmem:[%s4679_s1 + $0xe0] sm:$0xff] }
  0x6b   : > { %v309_v12 = vld [vmem:[%s4679_s1 + $0xf8] sm:$0xff]  ;;  %1060 = vst [vmem:[%s3300_s14 + $0xf8] sm:$0xff] %v3547_v10  ;;  %2575 = vmatprep.subr.bf16.mxu0 %v2574_v6  ;;  %2668 = vmatprep.subr.bf16.mxu1 %v2574_v6  ;;  %v308_v16 = vld [vmem:[%s4679_s1 + $0xf0] sm:$0xff]  ;;  %v310_v21 = vld [vmem:[%s4680_s2] sm:$0x3] }
  0x6c   : > { %v2578_v14 = vpack.c.bf16 %v309_v12, %v307_v11  ;;  %v2580_v17 = vpack.c.bf16 %v308_v16, %v306_v15  ;;  %v3628_v23 = vrot.slane %v310_v21, %v314_v20  ;;  %v3630_v24 = vrot.slane %v310_v21, %v318_v22 }
  0x6e   : > { %2577 = vmatpush1.bf16.msra.mxu0 %v2576_v13  ;;  %2676 = vmatpush1.bf16.msra.mxu1 %v2576_v13 }
  0x6f   : > { %2579 = vmatprep.subr.bf16.mxu0 %v2578_v14  ;;  %2669 = vmatprep.subr.bf16.mxu1 %v2578_v14 }
  0x72   : > { %2581 = vmatpush1.bf16.msra.mxu0 %v2580_v17  ;;  %2677 = vmatpush1.bf16.msra.mxu1 %v2580_v17 }
  0x75   : > { %387 = vmatmul.mubr.f32.vlgmr.msra.gmra.mrb[0].mxu0 %v3362_v26  ;;  %483 = vmatmul.mubr.f32.vlgmr.msra.gmra.mrb[0].mxu1 %v3373_v29 }
  0x76   : > { %488 = vmatprep.mubr.f32.mxu1 %v3079_v7  ;;  %392 = vmatprep.mubr.f32.mxu0 %v3079_v7 }
  0x79   : > { %489 = vmatmul.mubr.f32.gmra.mrb[2].mxu1 %v3376_v30  ;;  %393 = vmatmul.mubr.f32.gmra.mrb[2].mxu0 %v3379_v31 }
  0x7a   : > { %398 = vmatprep.mubr.f32.mxu0 %v3079_v7  ;;  %494 = vmatprep.mubr.f32.mxu1 %v3079_v7 }
  0x7d   : > { %399 = vmatmul.mubr.f32.gmra.mrb[4].mxu0 %v3394_v35  ;;  %495 = vmatmul.mubr.f32.gmra.mrb[4].mxu1 %v3397_v36 }
  0x7e   : > { %404 = vmatprep.mubr.f32.mxu0 %v3079_v7  ;;  %500 = vmatprep.mubr.f32.mxu1 %v3079_v7 }
  0x81   : > { %405 = vmatmul.mubr.f32.gmra.mrb[6].mxu0 %v3400_v37  ;;  %501 = vmatmul.mubr.f32.gmra.mrb[6].mxu1 %v3409_v39 }
  0x82   : > { %410 = vmatprep.mubr.f32.mxu0 %v3079_v7  ;;  %506 = vmatprep.mubr.f32.mxu1 %v3079_v7 }
  0x85   : > { %411 = vmatmul.mubr.f32.gmra.mrb[8].mxu0 %v3412_v40  ;;  %507 = vmatmul.mubr.f32.gmra.mrb[8].mxu1 %v3415_v41 }
  0x86   : > { %416 = vmatprep.mubr.f32.mxu0 %v3079_v7  ;;  %512 = vmatprep.mubr.f32.mxu1 %v3079_v7 }
  0x89   : > { %417 = vmatmul.mubr.f32.gmra.mrb[10].mxu0 %v3424_v42  ;;  %513 = vmatmul.mubr.f32.gmra.mrb[10].mxu1 %v3427_v43 }
  0x8a   : > { %422 = vmatprep.mubr.f32.mxu0 %v3079_v7  ;;  %518 = vmatprep.mubr.f32.mxu1 %v3079_v7 }
  0x8d   : > { %423 = vmatmul.mubr.f32.gmra.mrb[12].mxu0 %v3430_v44  ;;  %519 = vmatmul.mubr.f32.gmra.mrb[12].mxu1 %v3445_v47 }
  0x8e   : > { %428 = vmatprep.mubr.f32.mxu0 %v3079_v7  ;;  %524 = vmatprep.mubr.f32.mxu1 %v3079_v7 }
  0x91   : > { %429 = vmatmul.mubr.f32.gmra.mrb[14].mxu0 %v3448_v48  ;;  %525 = vmatmul.mubr.f32.gmra.mrb[14].mxu1 %v3451_v49 }
  0x92   : > { %434 = vmatprep.mubr.f32.mxu0 %v3079_v7  ;;  %530 = vmatprep.mubr.f32.mxu1 %v3079_v7 }
  0x95   : > { %435 = vmatmul.mubr.f32.gmra.mrb[16].mxu0 %v3466_v53  ;;  %531 = vmatmul.mubr.f32.gmra.mrb[16].mxu1 %v3469_v54 }
  0x96   : > { %440 = vmatprep.mubr.f32.mxu0 %v3079_v7  ;;  %536 = vmatprep.mubr.f32.mxu1 %v3079_v7 }
  0x99   : > { %441 = vmatmul.mubr.f32.gmra.mrb[18].mxu0 %v3472_v55  ;;  %537 = vmatmul.mubr.f32.gmra.mrb[18].mxu1 %v3481_v57 }
  0x9a   : > { %446 = vmatprep.mubr.f32.mxu0 %v3079_v7  ;;  %542 = vmatprep.mubr.f32.mxu1 %v3079_v7 }
  0x9d   : > { %447 = vmatmul.mubr.f32.gmra.mrb[20].mxu0 %v3484_v58  ;;  %543 = vmatmul.mubr.f32.gmra.mrb[20].mxu1 %v3487_v59 }
  0x9e   : > { %452 = vmatprep.mubr.f32.mxu0 %v3079_v7  ;;  %548 = vmatprep.mubr.f32.mxu1 %v3079_v7 }
  0xa1   : > { %453 = vmatmul.mubr.f32.gmra.mrb[22].mxu0 %v3496_v60  ;;  %549 = vmatmul.mubr.f32.gmra.mrb[22].mxu1 %v3499_v61 }
  0xa2   : > { %458 = vmatprep.mubr.f32.mxu0 %v3079_v7  ;;  %554 = vmatprep.mubr.f32.mxu1 %v3079_v7 }
  0xa5   : > { %459 = vmatmul.mubr.f32.gmra.mrb[24].mxu0 %v3502_v62  ;;  %555 = vmatmul.mubr.f32.gmra.mrb[24].mxu1 %v3511_v63 }
  0xa6   : > { %464 = vmatprep.mubr.f32.mxu0 %v3079_v7  ;;  %560 = vmatprep.mubr.f32.mxu1 %v3079_v7 }
  0xa9   : > { %465 = vmatmul.mubr.f32.gmra.mrb[26].mxu0 %v3514_v0  ;;  %561 = vmatmul.mubr.f32.gmra.mrb[26].mxu1 %v3517_v1 }
  0xaa   : > { %470 = vmatprep.mubr.f32.mxu0 %v3079_v7  ;;  %566 = vmatprep.mubr.f32.mxu1 %v3079_v7 }
  0xad   : > { %471 = vmatmul.mubr.f32.gmra.mrb[28].mxu0 %v3526_v3  ;;  %567 = vmatmul.mubr.f32.gmra.mrb[28].mxu1 %v3529_v4 }
  0xae   : > { %476 = vmatprep.mubr.f32.mxu0 %v3079_v7  ;;  %572 = vmatprep.mubr.f32.mxu1 %v3079_v7 }
  0xb1   : > { %477 = vmatmul.mubr.f32.gmra.mrb[30].mxu0 %v3532_v5  ;;  %573 = vmatmul.mubr.f32.gmra.mrb[30].mxu1 %v3547_v10 }
 0x148   : > { %v388_v25 = vpop.f32.mrb[0].mxu0  ;;  %v484_v26 = vpop.f32.mrb[0].mxu1 }
 0x149   : > { %v389_v7 = vadd.f32 %v388_v25, %v3628_v23  ;;  %v390_v27 = vpop.f32.mrb[1].mxu0  ;;  %v485_v28 = vadd.f32 %v484_v26, %v3628_v23  ;;  %v486_v29 = vpop.f32.mrb[1].mxu1 }
 0x14a   : > { %v391_v30 = vadd.f32 %v390_v27, %v3630_v24  ;;  %v487_v31 = vadd.f32 %v486_v29, %v3630_v24 }
 0x14b   : > { %580 = vst.msk [vmem:[#allocation2] sm:$0xff] %vm579_vm0, %v389_v7  ;;  %596 = vst.msk [vmem:[#allocation2 + $0x80] sm:$0xff] %vm579_vm0, %v485_v28  ;;  %644 = vrot.lane.b32.xlu0 %v389_v7, %s3080_s24 }
 0x14c   : > { %806 = vrot.lane.b32.xlu1 %v391_v30, %s3081_s13  ;;  %v490_v32 = vpop.f32.mrb[2].mxu1  ;;  %v394_v33 = vpop.f32.mrb[2].mxu0 }
 0x14d   : > { %v491_v34 = vadd.f32 %v490_v32, %v3628_v23  ;;  %v492_v35 = vpop.f32.mrb[3].mxu1  ;;  %v395_v36 = vadd.f32 %v394_v33, %v3628_v23  ;;  %v396_v37 = vpop.f32.mrb[3].mxu0 }
 0x14e   : > { %v397_v44 = vadd.f32 %v396_v37, %v3630_v24  ;;  %v493_v57 = vadd.f32 %v492_v35, %v3630_v24 }
 0x14f   : > { %676 = vrot.lane.b32.xlu0 %v485_v28, %s3080_s24  ;;  %597 = vst.msk [vmem:[#allocation2 + $0x88] sm:$0xff] %vm579_vm0, %v491_v34  ;;  %581 = vst.msk [vmem:[#allocation2 + $0x8] sm:$0xff] %vm579_vm0, %v395_v36 }
 0x150   : > { %870 = vrot.lane.b32.xlu1 %v487_v31, %s3081_s13  ;;  %v400_v38 = vpop.f32.mrb[4].mxu0  ;;  %v496_v39 = vpop.f32.mrb[4].mxu1 }
 0x151   : > { %v3647_v40 = vadd.f32 %v400_v38, %v3628_v23  ;;  %v402_v41 = vpop.f32.mrb[5].mxu0  ;;  %v3650_v42 = vadd.f32 %v496_v39, %v3628_v23  ;;  %v498_v43 = vpop.f32.mrb[5].mxu1 }
 0x152   : > { %v403_v9 = vadd.f32 %v402_v41, %v3630_v24  ;;  %v499_v12 = vadd.f32 %v498_v43, %v3630_v24 }
 0x153   : > { %804 = vrot.lane.b32.xlu0 %v389_v7, %s3081_s13  ;;  %582 = vst.msk [vmem:[#allocation2 + $0x10] sm:$0xff] %vm579_vm0, %v3647_v40  ;;  %598 = vst.msk [vmem:[#allocation2 + $0x90] sm:$0xff] %vm579_vm0, %v3650_v42 }
 0x154   : > { %678 = vrot.lane.b32.xlu1 %v491_v34, %s3080_s24  ;;  %v406_v45 = vpop.f32.mrb[6].mxu0  ;;  %v502_v46 = vpop.f32.mrb[6].mxu1 }
 0x155   : > { %v3660_v47 = vadd.f32 %v406_v45, %v3628_v23  ;;  %v3662_v48 = vpop.f32.mrb[7].mxu0  ;;  %v3665_v49 = vadd.f32 %v502_v46, %v3628_v23  ;;  %v3667_v50 = vpop.f32.mrb[7].mxu1 }
 0x157   : > { %868 = vrot.lane.b32.xlu0 %v485_v28, %s3081_s13  ;;  %583 = vst.msk [vmem:[#allocation2 + $0x18] sm:$0xff] %vm579_vm0, %v3660_v47  ;;  %599 = vst.msk [vmem:[#allocation2 + $0x98] sm:$0xff] %vm579_vm0, %v3665_v49 }
 0x158   : > { %810 = vrot.lane.b32.xlu1 %v397_v44, %s3081_s13  ;;  %v412_v51 = vpop.f32.mrb[8].mxu0  ;;  %v508_v52 = vpop.f32.mrb[8].mxu1 }
 0x159   : > { %v3676_v53 = vadd.f32 %v412_v51, %v3628_v23  ;;  %v3678_v54 = vpop.f32.mrb[9].mxu0  ;;  %v3681_v55 = vadd.f32 %v508_v52, %v3628_v23  ;;  %v3683_v56 = vpop.f32.mrb[9].mxu1 }
 0x15b   : > { %646 = vrot.lane.b32.xlu0 %v395_v36, %s3080_s24  ;;  %584 = vst.msk [vmem:[#allocation2 + $0x20] sm:$0xff] %vm579_vm0, %v3676_v53  ;;  %600 = vst.msk [vmem:[#allocation2 + $0xa0] sm:$0xff] %vm579_vm0, %v3681_v55 }
 0x15c   : > { %874 = vrot.lane.b32.xlu1 %v493_v57, %s3081_s13  ;;  %v418_v58 = vpop.f32.mrb[10].mxu0  ;;  %v514_v59 = vpop.f32.mrb[10].mxu1 }
 0x15d   : > { %v3693_v60 = vadd.f32 %v418_v58, %v3628_v23  ;;  %v420_v61 = vpop.f32.mrb[11].mxu0  ;;  %v3696_v62 = vadd.f32 %v514_v59, %v3628_v23  ;;  %v516_v63 = vpop.f32.mrb[11].mxu1 }
 0x15e   : > { %v3699_v0 = vadd.f32 %v420_v61, %v3630_v24  ;;  %v3702_v1 = vadd.f32 %v516_v63, %v3630_v24 }
 0x15f   : > { %808 = vrot.lane.b32.xlu0 %v395_v36, %s3081_s13  ;;  %585 = vst.msk [vmem:[#allocation2 + $0x28] sm:$0xff] %vm579_vm0, %v3693_v60  ;;  %601 = vst.msk [vmem:[#allocation2 + $0xa8] sm:$0xff] %vm579_vm0, %v3696_v62 }
 0x160   : > { %648 = vrot.lane.b32.xlu1 %v3647_v40, %s3080_s24  ;;  %v424_v2 = vpop.f32.mrb[12].mxu0  ;;  %v520_v3 = vpop.f32.mrb[12].mxu1 }
 0x161   : > { %v3712_v4 = vadd.f32 %v424_v2, %v3628_v23  ;;  %v426_v5 = vpop.f32.mrb[13].mxu0  ;;  %v3715_v6 = vadd.f32 %v520_v3, %v3628_v23  ;;  %v522_v8 = vpop.f32.mrb[13].mxu1  ;;  %v415_v2 = vadd.f32 %v3678_v54, %v3630_v24  ;;  %v511_v54 = vadd.f32 %v3683_v56, %v3630_v24 }
 0x162   : > { %v3719_v10 = vadd.f32 %v426_v5, %v3630_v24  ;;  %v3722_v11 = vadd.f32 %v522_v8, %v3630_v24 }
 0x163   : > { %872 = vrot.lane.b32.xlu0 %v491_v34, %s3081_s13  ;;  %586 = vst.msk [vmem:[#allocation2 + $0x30] sm:$0xff] %vm579_vm0, %v3712_v4  ;;  %602 = vst.msk [vmem:[#allocation2 + $0xb0] sm:$0xff] %vm579_vm0, %v3715_v6 }
 0x164   : > { %814 = vrot.lane.b32.xlu1 %v403_v9, %s3081_s13  ;;  %v430_v13 = vpop.f32.mrb[14].mxu0  ;;  %v526_v14 = vpop.f32.mrb[14].mxu1 }
 0x165   : > { %v3732_v15 = vadd.f32 %v430_v13, %v3628_v23  ;;  %v432_v16 = vpop.f32.mrb[15].mxu0  ;;  %v3735_v17 = vadd.f32 %v526_v14, %v3628_v23  ;;  %v528_v18 = vpop.f32.mrb[15].mxu1 }
 0x166   : > { %v3738_v19 = vadd.f32 %v432_v16, %v3630_v24  ;;  %v3741_v20 = vadd.f32 %v528_v18, %v3630_v24 }
 0x167   : > { %680 = vrot.lane.b32.xlu0 %v3650_v42, %s3080_s24  ;;  %587 = vst.msk [vmem:[#allocation2 + $0x38] sm:$0xff] %vm579_vm0, %v3732_v15  ;;  %603 = vst.msk [vmem:[#allocation2 + $0xb8] sm:$0xff] %vm579_vm0, %v3735_v17 }
 0x168   : > { %878 = vrot.lane.b32.xlu1 %v499_v12, %s3081_s13  ;;  %v436_v21 = vpop.f32.mrb[16].mxu0  ;;  %v532_v22 = vpop.f32.mrb[16].mxu1 }
 0x169   : > { %v3751_v25 = vadd.f32 %v436_v21, %v3628_v23  ;;  %v438_v26 = vpop.f32.mrb[17].mxu0  ;;  %v3754_v7 = vadd.f32 %v532_v22, %v3628_v23  ;;  %v534_v27 = vpop.f32.mrb[17].mxu1 }
 0x16a   : > { %v3757_v28 = vadd.f32 %v438_v26, %v3630_v24  ;;  %v3760_v29 = vadd.f32 %v534_v27, %v3630_v24 }
 0x16b   : > { %812 = vrot.lane.b32.xlu0 %v3647_v40, %s3081_s13  ;;  %588 = vst.msk [vmem:[#allocation2 + $0x40] sm:$0xff] %vm579_vm0, %v3751_v25  ;;  %604 = vst.msk [vmem:[#allocation2 + $0xc0] sm:$0xff] %vm579_vm0, %v3754_v7 }
 0x16c   : > { %650 = vrot.lane.b32.xlu1 %v3660_v47, %s3080_s24  ;;  %v442_v30 = vpop.f32.mrb[18].mxu0  ;;  %v538_v31 = vpop.f32.mrb[18].mxu1 }
 0x16d   : > { %v3771_v32 = vadd.f32 %v442_v30, %v3628_v23  ;;  %v444_v33 = vpop.f32.mrb[19].mxu0  ;;  %v3774_v34 = vadd.f32 %v538_v31, %v3628_v23  ;;  %v540_v35 = vpop.f32.mrb[19].mxu1 }
 0x16e   : > { %v3777_v36 = vadd.f32 %v444_v33, %v3630_v24  ;;  %v3780_v37 = vadd.f32 %v540_v35, %v3630_v24 }
 0x16f   : > { %876 = vrot.lane.b32.xlu0 %v3650_v42, %s3081_s13  ;;  %589 = vst.msk [vmem:[#allocation2 + $0x48] sm:$0xff] %vm579_vm0, %v3771_v32  ;;  %605 = vst.msk [vmem:[#allocation2 + $0xc8] sm:$0xff] %vm579_vm0, %v3774_v34  ;;  %v409_v42 = vadd.f32 %v3662_v48, %v3630_v24 }
 0x170   : > { %682 = vrot.lane.b32.xlu1 %v3665_v49, %s3080_s24  ;;  %v448_v38 = vpop.f32.mrb[20].mxu0  ;;  %v544_v39 = vpop.f32.mrb[20].mxu1 }
 0x171   : > { %v3791_v40 = vadd.f32 %v448_v38, %v3628_v23  ;;  %v450_v41 = vpop.f32.mrb[21].mxu0  ;;  %v3794_v43 = vadd.f32 %v544_v39, %v3628_v23  ;;  %v546_v44 = vpop.f32.mrb[21].mxu1 }
 0x172   : > { %v3799_v45 = vadd.f32 %v450_v41, %v3630_v24  ;;  %v3802_v46 = vadd.f32 %v546_v44, %v3630_v24 }
 0x173   : > { %816 = vrot.lane.b32.xlu0 %v3660_v47, %s3081_s13  ;;  %590 = vst.msk [vmem:[#allocation2 + $0x50] sm:$0xff] %vm579_vm0, %v3791_v40  ;;  %606 = vst.msk [vmem:[#allocation2 + $0xd0] sm:$0xff] %vm579_vm0, %v3794_v43  ;;  %v505_v47 = vadd.f32 %v3667_v50, %v3630_v24 }
 0x174   : > { %818 = vrot.lane.b32.xlu1 %v409_v42, %s3081_s13  ;;  %v454_v51 = vpop.f32.mrb[22].mxu0  ;;  %v550_v52 = vpop.f32.mrb[22].mxu1 }
 0x175   : > { %v3812_v48 = vadd.f32 %v454_v51, %v3628_v23  ;;  %v456_v57 = vpop.f32.mrb[23].mxu0  ;;  %v3815_v58 = vadd.f32 %v550_v52, %v3628_v23  ;;  %v552_v59 = vpop.f32.mrb[23].mxu1 }
 0x176   : > { %v3820_v61 = vadd.f32 %v456_v57, %v3630_v24  ;;  %v3823_v63 = vadd.f32 %v552_v59, %v3630_v24 }
 0x177   : > { %880 = vrot.lane.b32.xlu0 %v3665_v49, %s3081_s13  ;;  %591 = vst.msk [vmem:[#allocation2 + $0x58] sm:$0xff] %vm579_vm0, %v3812_v48  ;;  %607 = vst.msk [vmem:[#allocation2 + $0xd8] sm:$0xff] %vm579_vm0, %v3815_v58 }
 0x178   : > { %882 = vrot.lane.b32.xlu1 %v505_v47, %s3081_s13  ;;  %v460_v50 = vpop.f32.mrb[24].mxu0  ;;  %v556_v3 = vpop.f32.mrb[24].mxu1 }
 0x179   : > { %v3835_v5 = vadd.f32 %v460_v50, %v3628_v23  ;;  %v462_v8 = vpop.f32.mrb[25].mxu0  ;;  %v3838_v9 = vadd.f32 %v556_v3, %v3628_v23  ;;  %v558_v49 = vpop.f32.mrb[25].mxu1 }
 0x17a   : > { %v3841_v12 = vadd.f32 %v462_v8, %v3630_v24  ;;  %v3844_v13 = vadd.f32 %v558_v49, %v3630_v24 }
 0x17b   : > { %652 = vrot.lane.b32.xlu0 %v3676_v53, %s3080_s24  ;;  %592 = vst.msk [vmem:[#allocation2 + $0x60] sm:$0xff] %vm579_vm0, %v3835_v5  ;;  %608 = vst.msk [vmem:[#allocation2 + $0xe0] sm:$0xff] %vm579_vm0, %v3838_v9 }
 0x17c   : > { %822 = vrot.lane.b32.xlu1 %v415_v2, %s3081_s13  ;;  %v466_v14 = vpop.f32.mrb[26].mxu0  ;;  %v562_v16 = vpop.f32.mrb[26].mxu1 }
 0x17d   : > { %v3856_v18 = vadd.f32 %v466_v14, %v3628_v23  ;;  %v468_v21 = vpop.f32.mrb[27].mxu0  ;;  %v3859_v22 = vadd.f32 %v562_v16, %v3628_v23  ;;  %v564_v26 = vpop.f32.mrb[27].mxu1 }
 0x17e   : > { %v3862_v27 = vadd.f32 %v468_v21, %v3630_v24  ;;  %v3865_v30 = vadd.f32 %v564_v26, %v3630_v24 }
 0x17f   : > { %684 = vrot.lane.b32.xlu0 %v3681_v55, %s3080_s24  ;;  %593 = vst.msk [vmem:[#allocation2 + $0x68] sm:$0xff] %vm579_vm0, %v3856_v18  ;;  %609 = vst.msk [vmem:[#allocation2 + $0xe8] sm:$0xff] %vm579_vm0, %v3859_v22 }
 0x180   : > { %886 = vrot.lane.b32.xlu1 %v511_v54, %s3081_s13  ;;  %v472_v56 = vpop.f32.mrb[28].mxu0  ;;  %v568_v31 = vpop.f32.mrb[28].mxu1 }
 0x181   : > { %v3875_v33 = vadd.f32 %v472_v56, %v3628_v23  ;;  %v474_v35 = vpop.f32.mrb[29].mxu0  ;;  %v3878_v38 = vadd.f32 %v568_v31, %v3628_v23  ;;  %v570_v39 = vpop.f32.mrb[29].mxu1 }
 0x182   : > { %v3881_v41 = vadd.f32 %v474_v35, %v3630_v24  ;;  %v3884_v44 = vadd.f32 %v570_v39, %v3630_v24 }
 0x183   : > { %820 = vrot.lane.b32.xlu0 %v3676_v53, %s3081_s13  ;;  %594 = vst.msk [vmem:[#allocation2 + $0x70] sm:$0xff] %vm579_vm0, %v3875_v33  ;;  %610 = vst.msk [vmem:[#allocation2 + $0xf0] sm:$0xff] %vm579_vm0, %v3878_v38 }
 0x184   : > { %654 = vrot.lane.b32.xlu1 %v3693_v60, %s3080_s24  ;;  %v478_v42 = vpop.f32.mrb[30].mxu0  ;;  %v574_v51 = vpop.f32.mrb[30].mxu1 }
 0x185   : > { %v3895_v52 = vadd.f32 %v478_v42, %v3628_v23  ;;  %v480_v57 = vpop.f32.mrb[31].mxu0  ;;  %v3898_v59 = vadd.f32 %v574_v51, %v3628_v23  ;;  %v576_v47 = vpop.f32.mrb[31].mxu1 }
 0x186   : > { %v3901_v53 = vadd.f32 %v480_v57, %v3630_v24  ;;  %v3904_v2 = vadd.f32 %v576_v47, %v3630_v24 }
 0x187   : > { %884 = vrot.lane.b32.xlu0 %v3681_v55, %s3081_s13  ;;  %595 = vst.msk [vmem:[#allocation2 + $0x78] sm:$0xff] %vm579_vm0, %v3895_v52  ;;  %611 = vst.msk [vmem:[#allocation2 + $0xf8] sm:$0xff] %vm579_vm0, %v3898_v59 }
 0x188   : > { %686 = vrot.lane.b32.xlu1 %v3696_v62, %s3080_s24 }
 0x18b   : > { %824 = vrot.lane.b32.xlu0 %v3693_v60, %s3081_s13 }
 0x18c   : > { %826 = vrot.lane.b32.xlu1 %v3699_v0, %s3081_s13 }
 0x18f   : > { %888 = vrot.lane.b32.xlu0 %v3696_v62, %s3081_s13 }
 0x190   : > { %890 = vrot.lane.b32.xlu1 %v3702_v1, %s3081_s13 }
 0x193   : > { %656 = vrot.lane.b32.xlu0 %v3712_v4, %s3080_s24 }
 0x194   : > { %830 = vrot.lane.b32.xlu1 %v3719_v10, %s3081_s13 }
 0x197   : > { %688 = vrot.lane.b32.xlu0 %v3715_v6, %s3080_s24 }
 0x198   : > { %894 = vrot.lane.b32.xlu1 %v3722_v11, %s3081_s13 }
 0x19b   : > { %828 = vrot.lane.b32.xlu0 %v3712_v4, %s3081_s13 }
 0x19c   : > { %658 = vrot.lane.b32.xlu1 %v3732_v15, %s3080_s24 }
 0x19f   : > { %892 = vrot.lane.b32.xlu0 %v3715_v6, %s3081_s13 }
 0x1a0   : > { %690 = vrot.lane.b32.xlu1 %v3735_v17, %s3080_s24 }
 0x1a3   : > { %832 = vrot.lane.b32.xlu0 %v3732_v15, %s3081_s13 }
 0x1a4   : > { %834 = vrot.lane.b32.xlu1 %v3738_v19, %s3081_s13 }
 0x1a7   : > { %896 = vrot.lane.b32.xlu0 %v3735_v17, %s3081_s13 }
 0x1a8   : > { %898 = vrot.lane.b32.xlu1 %v3741_v20, %s3081_s13 }
 0x1ab   : > { %660 = vrot.lane.b32.xlu0 %v3751_v25, %s3080_s24 }
 0x1ac   : > { %838 = vrot.lane.b32.xlu1 %v3757_v28, %s3081_s13 }
 0x1af   : > { %692 = vrot.lane.b32.xlu0 %v3754_v7, %s3080_s24 }
 0x1b0   : > { %902 = vrot.lane.b32.xlu1 %v3760_v29, %s3081_s13 }
 0x1b3   : > { %836 = vrot.lane.b32.xlu0 %v3751_v25, %s3081_s13 }
 0x1b4   : > { %662 = vrot.lane.b32.xlu1 %v3771_v32, %s3080_s24 }
 0x1b7   : > { %900 = vrot.lane.b32.xlu0 %v3754_v7, %s3081_s13 }
 0x1b8   : > { %694 = vrot.lane.b32.xlu1 %v3774_v34, %s3080_s24 }
 0x1bb   : > { %840 = vrot.lane.b32.xlu0 %v3771_v32, %s3081_s13 }
 0x1bc   : > { %842 = vrot.lane.b32.xlu1 %v3777_v36, %s3081_s13 }
 0x1bd   : > { %v645_v23 = vpop.permute.xlu0 %644 }
 0x1be   : > { %740 = vst.msk [vmem:[#allocation3] sm:$0xff] %vm579_vm0, %v645_v23  ;;  %v807_v24 = vpop.permute.xlu1 %806 }
 0x1bf   : > { %904 = vrot.lane.b32.xlu0 %v3774_v34, %s3081_s13 }
 0x1c0   : > { %906 = vrot.lane.b32.xlu1 %v3780_v37, %s3081_s13 }
 0x1c1   : > { %v677_v55 = vpop.permute.xlu0 %676 }
 0x1c2   : > { %756 = vst.msk [vmem:[#allocation3 + $0x80] sm:$0xff] %vm579_vm0, %v677_v55  ;;  %v871_v60 = vpop.permute.xlu1 %870 }
 0x1c3   : > { %664 = vrot.lane.b32.xlu0 %v3791_v40, %s3080_s24 }
 0x1c4   : > { %846 = vrot.lane.b32.xlu1 %v3799_v45, %s3081_s13 }
 0x1c5   : > { %v805_v62 = vpop.permute.xlu0 %804 }
 0x1c6   : > { %v933_v0 = vsel %vm932_vm1, %v805_v62, %v807_v24  ;;  %v679_v1 = vpop.permute.xlu1 %678 }
 0x1c7   : > { %997 = vst [vmem:[#allocation4] sm:$0xff] %v933_v0  ;;  %757 = vst.msk [vmem:[#allocation3 + $0x88] sm:$0xff] %vm579_vm0, %v679_v1  ;;  %696 = vrot.lane.b32.xlu0 %v3794_v43, %s3080_s24 }
 0x1c8   : > { %910 = vrot.lane.b32.xlu1 %v3802_v46, %s3081_s13 }
 0x1c9   : > { %v869_v4 = vpop.permute.xlu0 %868 }
 0x1ca   : > { %v949_v6 = vsel %vm932_vm1, %v869_v4, %v871_v60  ;;  %v811_v10 = vpop.permute.xlu1 %810 }
 0x1cb   : > { %1013 = vst [vmem:[#allocation4 + $0x80] sm:$0xff] %v949_v6  ;;  %844 = vrot.lane.b32.xlu0 %v3791_v40, %s3081_s13 }
 0x1cc   : > { %666 = vrot.lane.b32.xlu1 %v3812_v48, %s3080_s24 }
 0x1cd   : > { %v647_v11 = vpop.permute.xlu0 %646 }
 0x1ce   : > { %741 = vst.msk [vmem:[#allocation3 + $0x8] sm:$0xff] %vm579_vm0, %v647_v11  ;;  %v875_v15 = vpop.permute.xlu1 %874 }
 0x1cf   : > { %908 = vrot.lane.b32.xlu0 %v3794_v43, %s3081_s13 }
 0x1d0   : > { %698 = vrot.lane.b32.xlu1 %v3815_v58, %s3080_s24 }
 0x1d1   : > { %v809_v17 = vpop.permute.xlu0 %808 }
 0x1d2   : > { %v934_v19 = vsel %vm932_vm1, %v809_v17, %v811_v10  ;;  %v649_v20 = vpop.permute.xlu1 %648 }
 0x1d3   : > { %998 = vst [vmem:[#allocation4 + $0x8] sm:$0xff] %v934_v19  ;;  %742 = vst.msk [vmem:[#allocation3 + $0x10] sm:$0xff] %vm579_vm0, %v649_v20  ;;  %848 = vrot.lane.b32.xlu0 %v3812_v48, %s3081_s13 }
 0x1d4   : > { %850 = vrot.lane.b32.xlu1 %v3820_v61, %s3081_s13 }
 0x1d5   : > { %v873_v25 = vpop.permute.xlu0 %872 }
 0x1d6   : > { %v950_v7 = vsel %vm932_vm1, %v873_v25, %v875_v15  ;;  %v815_v28 = vpop.permute.xlu1 %814 }
 0x1d7   : > { %1014 = vst [vmem:[#allocation4 + $0x88] sm:$0xff] %v950_v7  ;;  %912 = vrot.lane.b32.xlu0 %v3815_v58, %s3081_s13 }
 0x1d8   : > { %914 = vrot.lane.b32.xlu1 %v3823_v63, %s3081_s13 }
 0x1d9   : > { %v681_v29 = vpop.permute.xlu0 %680 }
 0x1da   : > { %758 = vst.msk [vmem:[#allocation3 + $0x90] sm:$0xff] %vm579_vm0, %v681_v29  ;;  %v879_v32 = vpop.permute.xlu1 %878 }
 0x1db   : > { %668 = vrot.lane.b32.xlu0 %v3835_v5, %s3080_s24 }
 0x1dc   : > { %854 = vrot.lane.b32.xlu1 %v3841_v12, %s3081_s13 }
 0x1dd   : > { %v813_v34 = vpop.permute.xlu0 %812 }
 0x1de   : > { %v935_v36 = vsel %vm932_vm1, %v813_v34, %v815_v28  ;;  %v651_v37 = vpop.permute.xlu1 %650 }
 0x1df   : > { %999 = vst [vmem:[#allocation4 + $0x10] sm:$0xff] %v935_v36  ;;  %743 = vst.msk [vmem:[#allocation3 + $0x18] sm:$0xff] %vm579_vm0, %v651_v37  ;;  %700 = vrot.lane.b32.xlu0 %v3838_v9, %s3080_s24 }
 0x1e0   : > { %918 = vrot.lane.b32.xlu1 %v3844_v13, %s3081_s13 }
 0x1e1   : > { %v877_v40 = vpop.permute.xlu0 %876 }
 0x1e2   : > { %v951_v43 = vsel %vm932_vm1, %v877_v40, %v879_v32  ;;  %v683_v45 = vpop.permute.xlu1 %682 }
 0x1e3   : > { %1015 = vst [vmem:[#allocation4 + $0x90] sm:$0xff] %v951_v43  ;;  %759 = vst.msk [vmem:[#allocation3 + $0x98] sm:$0xff] %vm579_vm0, %v683_v45  ;;  %852 = vrot.lane.b32.xlu0 %v3835_v5, %s3081_s13 }
 0x1e4   : > { %670 = vrot.lane.b32.xlu1 %v3856_v18, %s3080_s24 }
 0x1e5   : > { %v817_v46 = vpop.permute.xlu0 %816 }
 0x1e6   : > { %v819_v48 = vpop.permute.xlu1 %818 }
 0x1e7   : > { %v936_v58 = vsel %vm932_vm1, %v817_v46, %v819_v48  ;;  %916 = vrot.lane.b32.xlu0 %v3838_v9, %s3081_s13 }
 0x1e8   : > { %1000 = vst [vmem:[#allocation4 + $0x18] sm:$0xff] %v936_v58  ;;  %702 = vrot.lane.b32.xlu1 %v3859_v22, %s3080_s24 }
 0x1e9   : > { %v881_v61 = vpop.permute.xlu0 %880 }
 0x1ea   : > { %v883_v63 = vpop.permute.xlu1 %882 }
 0x1eb   : > { %v952_v50 = vsel %vm932_vm1, %v881_v61, %v883_v63  ;;  %856 = vrot.lane.b32.xlu0 %v3856_v18, %s3081_s13 }
 0x1ec   : > { %1016 = vst [vmem:[#allocation4 + $0x98] sm:$0xff] %v952_v50  ;;  %858 = vrot.lane.b32.xlu1 %v3862_v27, %s3081_s13 }
 0x1ed   : > { %v653_v3 = vpop.permute.xlu0 %652 }
 0x1ee   : > { %744 = vst.msk [vmem:[#allocation3 + $0x20] sm:$0xff] %vm579_vm0, %v653_v3  ;;  %v823_v5 = vpop.permute.xlu1 %822 }
 0x1ef   : > { %920 = vrot.lane.b32.xlu0 %v3859_v22, %s3081_s13 }
 0x1f0   : > { %922 = vrot.lane.b32.xlu1 %v3865_v30, %s3081_s13 }
 0x1f1   : > { %v685_v8 = vpop.permute.xlu0 %684 }
 0x1f2   : > { %760 = vst.msk [vmem:[#allocation3 + $0xa0] sm:$0xff] %vm579_vm0, %v685_v8  ;;  %v887_v9 = vpop.permute.xlu1 %886 }
 0x1f3   : > { %672 = vrot.lane.b32.xlu0 %v3875_v33, %s3080_s24 }
 0x1f4   : > { %862 = vrot.lane.b32.xlu1 %v3881_v41, %s3081_s13 }
 0x1f5   : > { %v821_v49 = vpop.permute.xlu0 %820 }
 0x1f6   : > { %v937_v12 = vsel %vm932_vm1, %v821_v49, %v823_v5  ;;  %v655_v13 = vpop.permute.xlu1 %654 }
 0x1f7   : > { %1001 = vst [vmem:[#allocation4 + $0x20] sm:$0xff] %v937_v12  ;;  %745 = vst.msk [vmem:[#allocation3 + $0x28] sm:$0xff] %vm579_vm0, %v655_v13  ;;  %704 = vrot.lane.b32.xlu0 %v3878_v38, %s3080_s24 }
 0x1f8   : > { %926 = vrot.lane.b32.xlu1 %v3884_v44, %s3081_s13 }
 0x1f9   : > { %v885_v54 = vpop.permute.xlu0 %884 }
 0x1fa   : > { %v953_v14 = vsel %vm932_vm1, %v885_v54, %v887_v9  ;;  %v687_v16 = vpop.permute.xlu1 %686 }
 0x1fb   : > { %1017 = vst [vmem:[#allocation4 + $0xa0] sm:$0xff] %v953_v14  ;;  %761 = vst.msk [vmem:[#allocation3 + $0xa8] sm:$0xff] %vm579_vm0, %v687_v16  ;;  %860 = vrot.lane.b32.xlu0 %v3875_v33, %s3081_s13 }
 0x1fc   : > { %674 = vrot.lane.b32.xlu1 %v3895_v52, %s3080_s24 }
 0x1fd   : > { %v825_v18 = vpop.permute.xlu0 %824 }
 0x1fe   : > { %v827_v21 = vpop.permute.xlu1 %826 }
 0x1ff   : > { %v938_v22 = vsel %vm932_vm1, %v825_v18, %v827_v21  ;;  %924 = vrot.lane.b32.xlu0 %v3878_v38, %s3081_s13 }
 0x200   : > { %1002 = vst [vmem:[#allocation4 + $0x28] sm:$0xff] %v938_v22  ;;  %706 = vrot.lane.b32.xlu1 %v3898_v59, %s3080_s24 }
 0x201   : > { %v889_v26 = vpop.permute.xlu0 %888 }
 0x202   : > { %v891_v27 = vpop.permute.xlu1 %890 }
 0x203   : > { %v954_v30 = vsel %vm932_vm1, %v889_v26, %v891_v27  ;;  %864 = vrot.lane.b32.xlu0 %v3895_v52, %s3081_s13 }
 0x204   : > { %1018 = vst [vmem:[#allocation4 + $0xa8] sm:$0xff] %v954_v30  ;;  %866 = vrot.lane.b32.xlu1 %v3901_v53, %s3081_s13 }
 0x205   : > { %v657_v56 = vpop.permute.xlu0 %656 }
 0x206   : > { %746 = vst.msk [vmem:[#allocation3 + $0x30] sm:$0xff] %vm579_vm0, %v657_v56  ;;  %v831_v31 = vpop.permute.xlu1 %830 }
 0x207   : > { %928 = vrot.lane.b32.xlu0 %v3898_v59, %s3081_s13 }
 0x208   : > { %930 = vrot.lane.b32.xlu1 %v3904_v2, %s3081_s13 }
 0x209   : > { %v689_v33 = vpop.permute.xlu0 %688 }
 0x20a   : > { %762 = vst.msk [vmem:[#allocation3 + $0xb0] sm:$0xff] %vm579_vm0, %v689_v33  ;;  %v895_v35 = vpop.permute.xlu1 %894 }
 0x20d   : > { %v829_v38 = vpop.permute.xlu0 %828 }
 0x20e   : > { %v939_v39 = vsel %vm932_vm1, %v829_v38, %v831_v31  ;;  %v659_v41 = vpop.permute.xlu1 %658 }
 0x20f   : > { %1003 = vst [vmem:[#allocation4 + $0x30] sm:$0xff] %v939_v39  ;;  %747 = vst.msk [vmem:[#allocation3 + $0x38] sm:$0xff] %vm579_vm0, %v659_v41 }
 0x211   : > { %v893_v44 = vpop.permute.xlu0 %892 }
 0x212   : > { %v955_v42 = vsel %vm932_vm1, %v893_v44, %v895_v35  ;;  %v691_v51 = vpop.permute.xlu1 %690 }
 0x213   : > { %1019 = vst [vmem:[#allocation4 + $0xb0] sm:$0xff] %v955_v42  ;;  %763 = vst.msk [vmem:[#allocation3 + $0xb8] sm:$0xff] %vm579_vm0, %v691_v51 }
 0x215   : > { %v833_v52 = vpop.permute.xlu0 %832 }
 0x216   : > { %v835_v57 = vpop.permute.xlu1 %834 }
 0x217   : > { %v940_v59 = vsel %vm932_vm1, %v833_v52, %v835_v57 }
 0x218   : > { %1004 = vst [vmem:[#allocation4 + $0x38] sm:$0xff] %v940_v59 }
 0x219   : > { %v897_v47 = vpop.permute.xlu0 %896 }
 0x21a   : > { %v899_v53 = vpop.permute.xlu1 %898 }
 0x21b   : > { %v956_v2 = vsel %vm932_vm1, %v897_v47, %v899_v53 }
 0x21c   : > { %1020 = vst [vmem:[#allocation4 + $0xb8] sm:$0xff] %v956_v2 }
 0x21d   : > { %v661_v23 = vpop.permute.xlu0 %660 }
 0x21e   : > { %748 = vst.msk [vmem:[#allocation3 + $0x40] sm:$0xff] %vm579_vm0, %v661_v23  ;;  %v839_v24 = vpop.permute.xlu1 %838 }
 0x221   : > { %v693_v55 = vpop.permute.xlu0 %692 }
 0x222   : > { %764 = vst.msk [vmem:[#allocation3 + $0xc0] sm:$0xff] %vm579_vm0, %v693_v55  ;;  %v903_v60 = vpop.permute.xlu1 %902 }
 0x225   : > { %v837_v62 = vpop.permute.xlu0 %836 }
 0x226   : > { %v941_v0 = vsel %vm932_vm1, %v837_v62, %v839_v24  ;;  %v663_v1 = vpop.permute.xlu1 %662 }
 0x227   : > { %1005 = vst [vmem:[#allocation4 + $0x40] sm:$0xff] %v941_v0  ;;  %749 = vst.msk [vmem:[#allocation3 + $0x48] sm:$0xff] %vm579_vm0, %v663_v1 }
 0x229   : > { %v901_v4 = vpop.permute.xlu0 %900 }
 0x22a   : > { %v957_v6 = vsel %vm932_vm1, %v901_v4, %v903_v60  ;;  %v695_v10 = vpop.permute.xlu1 %694 }
 0x22b   : > { %1021 = vst [vmem:[#allocation4 + $0xc0] sm:$0xff] %v957_v6  ;;  %765 = vst.msk [vmem:[#allocation3 + $0xc8] sm:$0xff] %vm579_vm0, %v695_v10 }
 0x22d   : > { %v841_v11 = vpop.permute.xlu0 %840 }
 0x22e   : > { %v843_v15 = vpop.permute.xlu1 %842 }
 0x22f   : > { %v942_v17 = vsel %vm932_vm1, %v841_v11, %v843_v15 }
 0x230   : > { %1006 = vst [vmem:[#allocation4 + $0x48] sm:$0xff] %v942_v17 }
 0x231   : > { %v905_v19 = vpop.permute.xlu0 %904 }
 0x232   : > { %v907_v20 = vpop.permute.xlu1 %906 }
 0x233   : > { %v958_v25 = vsel %vm932_vm1, %v905_v19, %v907_v20 }
 0x234   : > { %1022 = vst [vmem:[#allocation4 + $0xc8] sm:$0xff] %v958_v25 }
 0x235   : > { %v665_v7 = vpop.permute.xlu0 %664 }
 0x236   : > { %750 = vst.msk [vmem:[#allocation3 + $0x50] sm:$0xff] %vm579_vm0, %v665_v7  ;;  %v847_v28 = vpop.permute.xlu1 %846 }
 0x239   : > { %v697_v29 = vpop.permute.xlu0 %696 }
 0x23a   : > { %766 = vst.msk [vmem:[#allocation3 + $0xd0] sm:$0xff] %vm579_vm0, %v697_v29  ;;  %v911_v32 = vpop.permute.xlu1 %910 }
 0x23d   : > { %v845_v34 = vpop.permute.xlu0 %844 }
 0x23e   : > { %v943_v36 = vsel %vm932_vm1, %v845_v34, %v847_v28  ;;  %v667_v37 = vpop.permute.xlu1 %666 }
 0x23f   : > { %1007 = vst [vmem:[#allocation4 + $0x50] sm:$0xff] %v943_v36  ;;  %751 = vst.msk [vmem:[#allocation3 + $0x58] sm:$0xff] %vm579_vm0, %v667_v37 }
 0x241   : > { %v909_v40 = vpop.permute.xlu0 %908 }
 0x242   : > { %v959_v43 = vsel %vm932_vm1, %v909_v40, %v911_v32  ;;  %v699_v45 = vpop.permute.xlu1 %698 }
 0x243   : > { %1023 = vst [vmem:[#allocation4 + $0xd0] sm:$0xff] %v959_v43  ;;  %767 = vst.msk [vmem:[#allocation3 + $0xd8] sm:$0xff] %vm579_vm0, %v699_v45 }
 0x245   : > { %v849_v46 = vpop.permute.xlu0 %848 }
 0x246   : > { %v851_v48 = vpop.permute.xlu1 %850 }
 0x247   : > { %v944_v58 = vsel %vm932_vm1, %v849_v46, %v851_v48 }
 0x248   : > { %1008 = vst [vmem:[#allocation4 + $0x58] sm:$0xff] %v944_v58 }
 0x249   : > { %v913_v61 = vpop.permute.xlu0 %912 }
 0x24a   : > { %v915_v63 = vpop.permute.xlu1 %914 }
 0x24b   : > { %v960_v50 = vsel %vm932_vm1, %v913_v61, %v915_v63 }
 0x24c   : > { %1024 = vst [vmem:[#allocation4 + $0xd8] sm:$0xff] %v960_v50 }
 0x24d   : > { %v669_v3 = vpop.permute.xlu0 %668 }
 0x24e   : > { %752 = vst.msk [vmem:[#allocation3 + $0x60] sm:$0xff] %vm579_vm0, %v669_v3  ;;  %v855_v5 = vpop.permute.xlu1 %854 }
 0x251   : > { %v701_v8 = vpop.permute.xlu0 %700 }
 0x252   : > { %768 = vst.msk [vmem:[#allocation3 + $0xe0] sm:$0xff] %vm579_vm0, %v701_v8  ;;  %v919_v9 = vpop.permute.xlu1 %918 }
 0x255   : > { %v853_v49 = vpop.permute.xlu0 %852 }
 0x256   : > { %v945_v12 = vsel %vm932_vm1, %v853_v49, %v855_v5  ;;  %v671_v13 = vpop.permute.xlu1 %670 }
 0x257   : > { %1009 = vst [vmem:[#allocation4 + $0x60] sm:$0xff] %v945_v12  ;;  %753 = vst.msk [vmem:[#allocation3 + $0x68] sm:$0xff] %vm579_vm0, %v671_v13 }
 0x259   : > { %v917_v54 = vpop.permute.xlu0 %916 }
 0x25a   : > { %v961_v14 = vsel %vm932_vm1, %v917_v54, %v919_v9  ;;  %v703_v16 = vpop.permute.xlu1 %702 }
 0x25b   : > { %1025 = vst [vmem:[#allocation4 + $0xe0] sm:$0xff] %v961_v14  ;;  %769 = vst.msk [vmem:[#allocation3 + $0xe8] sm:$0xff] %vm579_vm0, %v703_v16 }
 0x25d   : > { %v857_v18 = vpop.permute.xlu0 %856 }
 0x25e   : > { %v859_v21 = vpop.permute.xlu1 %858 }
 0x25f   : > { %v946_v22 = vsel %vm932_vm1, %v857_v18, %v859_v21 }
 0x260   : > { %1010 = vst [vmem:[#allocation4 + $0x68] sm:$0xff] %v946_v22 }
 0x261   : > { %v921_v26 = vpop.permute.xlu0 %920 }
 0x262   : > { %v923_v27 = vpop.permute.xlu1 %922 }
 0x263   : > { %v962_v30 = vsel %vm932_vm1, %v921_v26, %v923_v27 }
 0x264   : > { %1026 = vst [vmem:[#allocation4 + $0xe8] sm:$0xff] %v962_v30 }
 0x265   : > { %v673_v56 = vpop.permute.xlu0 %672 }
 0x266   : > { %754 = vst.msk [vmem:[#allocation3 + $0x70] sm:$0xff] %vm579_vm0, %v673_v56  ;;  %v863_v31 = vpop.permute.xlu1 %862 }
 0x269   : > { %v705_v33 = vpop.permute.xlu0 %704 }
 0x26a   : > { %770 = vst.msk [vmem:[#allocation3 + $0xf0] sm:$0xff] %vm579_vm0, %v705_v33  ;;  %v927_v35 = vpop.permute.xlu1 %926 }
 0x26d   : > { %v861_v38 = vpop.permute.xlu0 %860 }
 0x26e   : > { %v947_v39 = vsel %vm932_vm1, %v861_v38, %v863_v31  ;;  %v675_v41 = vpop.permute.xlu1 %674 }
 0x26f   : > { %1011 = vst [vmem:[#allocation4 + $0x70] sm:$0xff] %v947_v39  ;;  %755 = vst.msk [vmem:[#allocation3 + $0x78] sm:$0xff] %vm579_vm0, %v675_v41 }
 0x271   : > { %v925_v44 = vpop.permute.xlu0 %924 }
 0x272   : > { %v963_v42 = vsel %vm932_vm1, %v925_v44, %v927_v35  ;;  %v707_v51 = vpop.permute.xlu1 %706 }
 0x273   : > { %1027 = vst [vmem:[#allocation4 + $0xf0] sm:$0xff] %v963_v42  ;;  %771 = vst.msk [vmem:[#allocation3 + $0xf8] sm:$0xff] %vm579_vm0, %v707_v51 }
 0x275   : > { %v865_v52 = vpop.permute.xlu0 %864 }
 0x276   : > { %v867_v57 = vpop.permute.xlu1 %866 }
 0x277   : > { %v948_v59 = vsel %vm932_vm1, %v865_v52, %v867_v57 }
 0x278   : > { %1012 = vst [vmem:[#allocation4 + $0x78] sm:$0xff] %v948_v59 }
 0x279   : > { %v929_v47 = vpop.permute.xlu0 %928 }
 0x27a   : > { %v931_v53 = vpop.permute.xlu1 %930 }
 0x27b   : > { %v964_v2 = vsel %vm932_vm1, %v929_v47, %v931_v53 }
 0x27c   : > { %1028 = vst [vmem:[#allocation4 + $0xf8] sm:$0xff] %v964_v2 }
 0x27d PF: > { %v1112_v23 = vld [vmem:[#allocation3 + $0x80] sm:$0xff]  ;;  %v1113_v24 = vld [vmem:[#allocation3 + $0x88] sm:$0xff]  ;;  %vm1128_vm2 = vcmask 261120   ;;  %v1114_v1 = vld [vmem:[#allocation3 + $0x90] sm:$0xff]  ;;  %s2296_s0 = sshll.u32 %s3058_s21, 7  ;;  %s2357_s5 = sshll.u32 %s3058_s21, 5 }
 0x27e   : > { %v1096_v55 = vld [vmem:[#allocation3] sm:$0xff]  ;;  %v2582_v60 = vpack.c.bf16 %v1113_v24, %v1112_v23  ;;  %vm4108_vm3 = vmpackc.low %vm1128_vm2, %vm1128_vm2  ;;  %v1097_v0 = vld [vmem:[#allocation3 + $0x8] sm:$0xff]  ;;  %s4121_s28 = scalar_lea.vmem [#allocation2], %s2296_s0  ;;  %s4423_s23 = scalar_lea.vmem [#allocation4], %s2296_s0 }
 0x27f   : > { %v2585_v4 = vpack.c.bf16 %v1097_v0, %v1096_v55  ;;  %v1115_v6 = vld [vmem:[#allocation3 + $0x98] sm:$0xff]  ;;  %v1098_v11 = vld [vmem:[#allocation3 + $0x10] sm:$0xff]  ;;  %v1116_v17 = vld [vmem:[#allocation3 + $0xa0] sm:$0xff]  ;;  %s2351_s26 = sshll.u32 %s3062_s22, 6  ;;  %s2161_s20 = sshll.u32 %s3302_s7, 4  ;;  %s4513_s20 = int_to_ptr.vmem [resolvable:$true] %s2161_s20 }
 0x280   : > { %2584 = vmatprep.subr.msk.bf16.mxu0 %vm4108_vm3, %v2582_v60  ;;  %v2588_v10 = vpack.c.bf16 %v1115_v6, %v1114_v1  ;;  %v1099_v15 = vld [vmem:[#allocation3 + $0x18] sm:$0xff]  ;;  %v1117_v19 = vld [vmem:[#allocation3 + $0xa8] sm:$0xff]  ;;  %v1063_v7 = vld [vmem:[%s4121_s28] sm:$0xff]  ;;  %s2158_s8 = sadd.s32 %s2357_s5, %s2351_s26  ;;  %s4713_s13 = sand.u32 1, %s3038_s16  }
 0x281   : > { %2587 = vmatpush3.bf16.xpose.msk.msra.mxu0 %vm4108_vm3, %v2585_v4  ;;  %v2591_v20 = vpack.c.bf16 %v1099_v15, %v1098_v11  ;;  %v2594_v25 = vpack.c.bf16 %v1117_v19, %v1116_v17  ;;  %2390 = vmatprep.mubr.msk.f32.mxu0 %vm1128_vm2, %v1063_v7  ;;  %v1100_v28 = vld [vmem:[#allocation3 + $0x20] sm:$0xff]  ;;  %v1101_v29 = vld [vmem:[#allocation3 + $0x28] sm:$0xff]  ;;  %v1118_v32 = vld [vmem:[#allocation3 + $0xb0] sm:$0xff]  ;;  %s2352_s12 = sshll.u32 %s2158_s8, 7  ;;  %s4517_s0 = scalar_lea.sflag [#allocation10], %s4713_s13 }
 0x282   : > { %2590 = vmatprep.subr.msk.bf16.mxu0 %vm4108_vm3, %v2588_v10  ;;  %v1119_v34 = vld [vmem:[#allocation3 + $0xb8] sm:$0xff]  ;;  %v2597_v36 = vpack.c.bf16 %v1101_v29, %v1100_v28  ;;  %v1102_v40 = vld [vmem:[#allocation3 + $0x30] sm:$0xff]  ;;  %v1120_v45 = vld [vmem:[#allocation3 + $0xc0] sm:$0xff]  ;;  %s4511_s24 = scalar_lea.hbm %s4682_s4, %s2352_s12  ;;  %p4714_p2 = scmp.ne.s32.totalorder %s4706_s29, 0 }
 0x283   : > { %v2600_v37 = vpack.c.bf16 %v1119_v34, %v1118_v32  ;;  %v1103_v43 = vld [vmem:[#allocation3 + $0x38] sm:$0xff]  ;;  %v1121_v46 = vld [vmem:[#allocation3 + $0xc8] sm:$0xff]  ;;  %v1104_v61 = vld [vmem:[#allocation3 + $0x40] sm:$0xff]  ;;  %s3082_s21 = smov [#allocation9]  }
 0x284   : > { %v2603_v48 = vpack.c.bf16 %v1103_v43, %v1102_v40  ;;  %v2606_v58 = vpack.c.bf16 %v1121_v46, %v1120_v45  ;;  %v1105_v63 = vld [vmem:[#allocation3 + $0x48] sm:$0xff]  ;;  %v1122_v50 = vld [vmem:[#allocation3 + $0xd0] sm:$0xff]  ;;  %v1123_v3 = vld [vmem:[#allocation3 + $0xd8] sm:$0xff] }
 0x285   : > { %v2609_v5 = vpack.c.bf16 %v1105_v63, %v1104_v61  ;;  %v2612_v8 = vpack.c.bf16 %v1123_v3, %v1122_v50  ;;  %v1106_v9 = vld [vmem:[#allocation3 + $0x50] sm:$0xff]  ;;  %v1107_v49 = vld [vmem:[#allocation3 + $0x58] sm:$0xff]  ;;  %v1124_v12 = vld [vmem:[#allocation3 + $0xe0] sm:$0xff] }
 0x286   : > { %v1125_v13 = vld [vmem:[#allocation3 + $0xe8] sm:$0xff]  ;;  %v2615_v54 = vpack.c.bf16 %v1107_v49, %v1106_v9  ;;  %v1108_v16 = vld [vmem:[#allocation3 + $0x60] sm:$0xff]  ;;  %v1126_v21 = vld [vmem:[#allocation3 + $0xf0] sm:$0xff] }
 0x287   : > { %v2618_v14 = vpack.c.bf16 %v1125_v13, %v1124_v12  ;;  %v1109_v18 = vld [vmem:[#allocation3 + $0x68] sm:$0xff]  ;;  %v1127_v22 = vld [vmem:[#allocation3 + $0xf8] sm:$0xff]  ;;  %v1110_v30 = vld [vmem:[#allocation3 + $0x70] sm:$0xff] }
 0x288   : > { %v2621_v26 = vpack.c.bf16 %v1109_v18, %v1108_v16  ;;  %v2624_v27 = vpack.c.bf16 %v1127_v22, %v1126_v21  ;;  %v1111_v56 = vld [vmem:[#allocation3 + $0x78] sm:$0xff]  ;;  %v1064_v33 = vld [vmem:[%s4121_s28 + $0x8] sm:$0xff]  ;;  %v1065_v35 = vld [vmem:[%s4121_s28 + $0x10] sm:$0xff] }
 0x289   : > { %2593 = vmatpush3.bf16.xpose.msk.msra.mxu0 %vm4108_vm3, %v2591_v20  ;;  %v2627_v31 = vpack.c.bf16 %v1111_v56, %v1110_v30  ;;  %v1066_v38 = vld [vmem:[%s4121_s28 + $0x18] sm:$0xff]  ;;  %v1067_v39 = vld [vmem:[%s4121_s28 + $0x20] sm:$0xff]  ;;  %v1068_v41 = vld [vmem:[%s4121_s28 + $0x28] sm:$0xff] }
 0x28a   : > { %2596 = vmatprep.subr.msk.bf16.mxu0 %vm4108_vm3, %v2594_v25  ;;  %v1069_v44 = vld [vmem:[%s4121_s28 + $0x30] sm:$0xff]  ;;  %v1070_v42 = vld [vmem:[%s4121_s28 + $0x38] sm:$0xff]  ;;  %v1071_v51 = vld [vmem:[%s4121_s28 + $0x40] sm:$0xff] }
 0x28b   : > { %v1072_v52 = vld [vmem:[%s4121_s28 + $0x48] sm:$0xff]  ;;  %v1073_v57 = vld [vmem:[%s4121_s28 + $0x50] sm:$0xff]  ;;  %v1074_v59 = vld [vmem:[%s4121_s28 + $0x58] sm:$0xff] }
 0x28c   : > { %v1075_v47 = vld [vmem:[%s4121_s28 + $0x60] sm:$0xff]  ;;  %v1076_v53 = vld [vmem:[%s4121_s28 + $0x68] sm:$0xff]  ;;  %v1077_v2 = vld [vmem:[%s4121_s28 + $0x70] sm:$0xff] }
 0x28d   : > { %v1078_v23 = vld [vmem:[%s4121_s28 + $0x78] sm:$0xff]  ;;  %s2920_s28 = scalar_lea.vmem %s4513_s20, 4096 }
 0x28e   : > { %p2921_p9 = scmp.ne.s32.totalorder %s4513_s20, %s2920_s28 }
 0x290   : > { %p2922_p6 = pnand %p2921_p9, %p4714_p2 }
 0x291   : > { %2599 = vmatpush3.bf16.xpose.msk.msra.mxu0 %vm4108_vm3, %v2597_v36 }
 0x292   : > { %2602 = vmatprep.subr.msk.bf16.mxu0 %vm4108_vm3, %v2600_v37  ;;  %p2923_p0 = pneg %p2922_p6 }
 0x299   : > { %2605 = vmatpush3.bf16.xpose.msk.msra.mxu0 %vm4108_vm3, %v2603_v48 }
 0x29a   : > { %2608 = vmatprep.subr.msk.bf16.mxu0 %vm4108_vm3, %v2606_v58 }
 0x2a1   : > { %2611 = vmatpush3.bf16.xpose.msk.msra.mxu0 %vm4108_vm3, %v2609_v5 }
 0x2a2   : > { %2614 = vmatprep.subr.msk.bf16.mxu0 %vm4108_vm3, %v2612_v8 }
 0x2a9   : > { %2617 = vmatpush3.bf16.xpose.msk.msra.mxu0 %vm4108_vm3, %v2615_v54 }
 0x2aa   : > { %2620 = vmatprep.subr.msk.bf16.mxu0 %vm4108_vm3, %v2618_v14 }
 0x2b1   : > { %2623 = vmatpush3.bf16.xpose.msk.msra.mxu0 %vm4108_vm3, %v2621_v26 }
 0x2b2   : > { %2626 = vmatprep.subr.msk.bf16.mxu0 %vm4108_vm3, %v2624_v27 }
 0x2b9   : > { %2629 = vmatpush3.bf16.xpose.msk.msra.mxu0 %vm4108_vm3, %v2627_v31 }
 0x2c0   : > { %2391 = vmatmul.mubr.msk.f32.vlgmr.msra.gmra.mrb[0].mxu0 %vm1128_vm2, %v1063_v7 }
 0x2c1   : > { %2392 = vmatprep.mubr.msk.f32.mxu0 %vm1128_vm2, %v1064_v33 }
 0x2c4   : > { %2393 = vmatmul.mubr.msk.f32.gmra.mrb[2].mxu0 %vm1128_vm2, %v1064_v33 }
 0x2c5   : > { %2394 = vmatprep.mubr.msk.f32.mxu0 %vm1128_vm2, %v1065_v35 }
 0x2c8   : > { %2395 = vmatmul.mubr.msk.f32.gmra.mrb[4].mxu0 %vm1128_vm2, %v1065_v35 }
 0x2c9   : > { %2396 = vmatprep.mubr.msk.f32.mxu0 %vm1128_vm2, %v1066_v38 }
 0x2cc   : > { %2397 = vmatmul.mubr.msk.f32.gmra.mrb[6].mxu0 %vm1128_vm2, %v1066_v38 }
 0x2cd   : > { %2398 = vmatprep.mubr.msk.f32.mxu0 %vm1128_vm2, %v1067_v39 }
 0x2d0   : > { %2399 = vmatmul.mubr.msk.f32.gmra.mrb[8].mxu0 %vm1128_vm2, %v1067_v39 }
 0x2d1   : > { %2400 = vmatprep.mubr.msk.f32.mxu0 %vm1128_vm2, %v1068_v41 }
 0x2d4   : > { %2401 = vmatmul.mubr.msk.f32.gmra.mrb[10].mxu0 %vm1128_vm2, %v1068_v41 }
 0x2d5   : > { %2402 = vmatprep.mubr.msk.f32.mxu0 %vm1128_vm2, %v1069_v44 }
 0x2d8   : > { %2403 = vmatmul.mubr.msk.f32.gmra.mrb[12].mxu0 %vm1128_vm2, %v1069_v44 }
 0x2d9   : > { %2404 = vmatprep.mubr.msk.f32.mxu0 %vm1128_vm2, %v1070_v42 }
 0x2dc   : > { %2405 = vmatmul.mubr.msk.f32.gmra.mrb[14].mxu0 %vm1128_vm2, %v1070_v42 }
 0x2dd   : > { %2406 = vmatprep.mubr.msk.f32.mxu0 %vm1128_vm2, %v1071_v51 }
 0x2e0   : > { %2407 = vmatmul.mubr.msk.f32.gmra.mrb[16].mxu0 %vm1128_vm2, %v1071_v51 }
 0x2e1   : > { %2408 = vmatprep.mubr.msk.f32.mxu0 %vm1128_vm2, %v1072_v52 }
 0x2e4   : > { %2409 = vmatmul.mubr.msk.f32.gmra.mrb[18].mxu0 %vm1128_vm2, %v1072_v52 }
 0x2e5   : > { %2410 = vmatprep.mubr.msk.f32.mxu0 %vm1128_vm2, %v1073_v57 }
 0x2e8   : > { %2411 = vmatmul.mubr.msk.f32.gmra.mrb[20].mxu0 %vm1128_vm2, %v1073_v57 }
 0x2e9   : > { %2412 = vmatprep.mubr.msk.f32.mxu0 %vm1128_vm2, %v1074_v59 }
 0x2ec   : > { %2413 = vmatmul.mubr.msk.f32.gmra.mrb[22].mxu0 %vm1128_vm2, %v1074_v59 }
 0x2ed   : > { %2414 = vmatprep.mubr.msk.f32.mxu0 %vm1128_vm2, %v1075_v47 }
 0x2f0   : > { %2415 = vmatmul.mubr.msk.f32.gmra.mrb[24].mxu0 %vm1128_vm2, %v1075_v47 }
 0x2f1   : > { %2416 = vmatprep.mubr.msk.f32.mxu0 %vm1128_vm2, %v1076_v53 }
 0x2f4   : > { %2417 = vmatmul.mubr.msk.f32.gmra.mrb[26].mxu0 %vm1128_vm2, %v1076_v53 }
 0x2f5   : > { %2418 = vmatprep.mubr.msk.f32.mxu0 %vm1128_vm2, %v1077_v2 }
 0x2f8   : > { %2419 = vmatmul.mubr.msk.f32.gmra.mrb[28].mxu0 %vm1128_vm2, %v1077_v2 }
 0x2f9   : > { %2420 = vmatprep.mubr.msk.f32.mxu0 %vm1128_vm2, %v1078_v23 }
 0x2fc   : > { %2421 = vmatmul.mubr.msk.f32.gmra.mrb[30].mxu0 %vm1128_vm2, %v1078_v23 }
 0x393   : > { %v1339_v24 = vpop.f32.mrb[0].mxu0 }
 0x394   : > { %v4197_v55 = vmul.f32 0.17677669, %v1339_v24  ;;  %v1341_v60 = vpop.f32.mrb[1].mxu0 }
 0x395   : > { %v4199_v62 = vmul.f32 0.17677669, %v1341_v60 }
 0x397   : > { %v1345_v0 = vpop.f32.mrb[2].mxu0  ;;  %v1466_v1 = vmax.f32 %v4197_v55, %v4199_v62 }
 0x398   : > { %v4203_v4 = vmul.f32 0.17677669, %v1345_v0  ;;  %v1347_v6 = vpop.f32.mrb[3].mxu0 }
 0x399   : > { %v4205_v10 = vmul.f32 0.17677669, %v1347_v6  ;;  %1467 = vmax.xlane.f32.xlu0 %v1466_v1 }
 0x39b   : > { %v1351_v11 = vpop.f32.mrb[4].mxu0  ;;  %v1469_v15 = vmax.f32 %v4203_v4, %v4205_v10 }
 0x39c   : > { %v4209_v17 = vmul.f32 0.17677669, %v1351_v11  ;;  %v1353_v19 = vpop.f32.mrb[5].mxu0 }
 0x39d   : > { %v4211_v20 = vmul.f32 0.17677669, %v1353_v19  ;;  %1470 = vmax.xlane.f32.xlu0 %v1469_v15 }
 0x39f   : > { %v1357_v25 = vpop.f32.mrb[6].mxu0  ;;  %v1472_v7 = vmax.f32 %v4209_v17, %v4211_v20 }
 0x3a0   : > { %v4215_v28 = vmul.f32 0.17677669, %v1357_v25  ;;  %v1359_v29 = vpop.f32.mrb[7].mxu0 }
 0x3a1   : > { %v4217_v32 = vmul.f32 0.17677669, %v1359_v29  ;;  %1473 = vmax.xlane.f32.xlu1 %v1472_v7 }
 0x3a3   : > { %v1363_v34 = vpop.f32.mrb[8].mxu0  ;;  %v1475_v36 = vmax.f32 %v4215_v28, %v4217_v32 }
 0x3a4   : > { %v4221_v37 = vmul.f32 0.17677669, %v1363_v34  ;;  %v1365_v40 = vpop.f32.mrb[9].mxu0 }
 0x3a5   : > { %v4223_v43 = vmul.f32 0.17677669, %v1365_v40  ;;  %1476 = vmax.xlane.f32.xlu1 %v1475_v36 }
 0x3a7   : > { %v1369_v45 = vpop.f32.mrb[10].mxu0  ;;  %v1478_v46 = vmax.f32 %v4221_v37, %v4223_v43 }
 0x3a8   : > { %v4227_v48 = vmul.f32 0.17677669, %v1369_v45  ;;  %v1371_v58 = vpop.f32.mrb[11].mxu0 }
 0x3a9   : > { %v4229_v61 = vmul.f32 0.17677669, %v1371_v58  ;;  %1479 = vmax.xlane.f32.xlu0 %v1478_v46 }
 0x3ab   : > { %v1375_v63 = vpop.f32.mrb[12].mxu0  ;;  %v1481_v50 = vmax.f32 %v4227_v48, %v4229_v61 }
 0x3ac   : > { %v4233_v3 = vmul.f32 0.17677669, %v1375_v63  ;;  %v1377_v5 = vpop.f32.mrb[13].mxu0 }
 0x3ad   : > { %v4235_v8 = vmul.f32 0.17677669, %v1377_v5  ;;  %1482 = vmax.xlane.f32.xlu1 %v1481_v50 }
 0x3af   : > { %v1381_v9 = vpop.f32.mrb[14].mxu0  ;;  %v1484_v49 = vmax.f32 %v4233_v3, %v4235_v8 }
 0x3b0   : > { %v4239_v12 = vmul.f32 0.17677669, %v1381_v9  ;;  %v1383_v13 = vpop.f32.mrb[15].mxu0 }
 0x3b1   : > { %v4241_v54 = vmul.f32 0.17677669, %v1383_v13  ;;  %1485 = vmax.xlane.f32.xlu0 %v1484_v49 }
 0x3b3   : > { %v1387_v14 = vpop.f32.mrb[16].mxu0  ;;  %v1487_v16 = vmax.f32 %v4239_v12, %v4241_v54 }
 0x3b4   : > { %v4245_v18 = vmul.f32 0.17677669, %v1387_v14  ;;  %v1389_v21 = vpop.f32.mrb[17].mxu0 }
 0x3b5   : > { %v4247_v22 = vmul.f32 0.17677669, %v1389_v21  ;;  %1488 = vmax.xlane.f32.xlu1 %v1487_v16 }
 0x3b7   : > { %v1393_v26 = vpop.f32.mrb[18].mxu0  ;;  %v1490_v27 = vmax.f32 %v4245_v18, %v4247_v22 }
 0x3b8   : > { %v4251_v30 = vmul.f32 0.17677669, %v1393_v26  ;;  %v1395_v56 = vpop.f32.mrb[19].mxu0 }
 0x3b9   : > { %v4253_v31 = vmul.f32 0.17677669, %v1395_v56  ;;  %1491 = vmax.xlane.f32.xlu0 %v1490_v27 }
 0x3bb   : > { %v1399_v33 = vpop.f32.mrb[20].mxu0  ;;  %v1493_v35 = vmax.f32 %v4251_v30, %v4253_v31 }
 0x3bc   : > { %v4257_v38 = vmul.f32 0.17677669, %v1399_v33  ;;  %v1401_v39 = vpop.f32.mrb[21].mxu0 }
 0x3bd   : > { %v4259_v41 = vmul.f32 0.17677669, %v1401_v39  ;;  %1494 = vmax.xlane.f32.xlu1 %v1493_v35 }
 0x3bf   : > { %v1405_v44 = vpop.f32.mrb[22].mxu0  ;;  %v1496_v42 = vmax.f32 %v4257_v38, %v4259_v41 }
 0x3c0   : > { %v4263_v51 = vmul.f32 0.17677669, %v1405_v44  ;;  %v1407_v52 = vpop.f32.mrb[23].mxu0 }
 0x3c1   : > { %v4265_v57 = vmul.f32 0.17677669, %v1407_v52  ;;  %1497 = vmax.xlane.f32.xlu0 %v1496_v42 }
 0x3c3   : > { %v1411_v59 = vpop.f32.mrb[24].mxu0  ;;  %v1499_v47 = vmax.f32 %v4263_v51, %v4265_v57 }
 0x3c4   : > { %v4269_v53 = vmul.f32 0.17677669, %v1411_v59  ;;  %v1413_v2 = vpop.f32.mrb[25].mxu0 }
 0x3c5   : > { %v4271_v23 = vmul.f32 0.17677669, %v1413_v2  ;;  %1500 = vmax.xlane.f32.xlu1 %v1499_v47 }
 0x3c7   : > { %v1417_v24 = vpop.f32.mrb[26].mxu0  ;;  %v1502_v60 = vmax.f32 %v4269_v53, %v4271_v23 }
 0x3c8   : > { %v4275_v0 = vmul.f32 0.17677669, %v1417_v24  ;;  %v1419_v1 = vpop.f32.mrb[27].mxu0 }
 0x3c9   : > { %v4277_v6 = vmul.f32 0.17677669, %v1419_v1  ;;  %1503 = vmax.xlane.f32.xlu0 %v1502_v60 }
 0x3cb   : > { %v1423_v11 = vpop.f32.mrb[28].mxu0  ;;  %v1505_v15 = vmax.f32 %v4275_v0, %v4277_v6 }
 0x3cc   : > { %v4281_v19 = vmul.f32 0.17677669, %v1423_v11  ;;  %v1425_v25 = vpop.f32.mrb[29].mxu0 }
 0x3cd   : > { %v4283_v7 = vmul.f32 0.17677669, %v1425_v25  ;;  %1506 = vmax.xlane.f32.xlu1 %v1505_v15 }
 0x3cf   : > { %v1429_v29 = vpop.f32.mrb[30].mxu0  ;;  %v1508_v34 = vmax.f32 %v4281_v19, %v4283_v7 }
 0x3d0   : > { %v4287_v36 = vmul.f32 0.17677669, %v1429_v29  ;;  %v1431_v40 = vpop.f32.mrb[31].mxu0 }
 0x3d1   : > { %v4289_v45 = vmul.f32 0.17677669, %v1431_v40  ;;  %1509 = vmax.xlane.f32.xlu0 %v1508_v34 }
 0x3d3   : > { %v1511_v46 = vmax.f32 %v4287_v36, %v4289_v45 }
 0x3d5   : > { %1512 = vmax.xlane.f32.xlu1 %v1511_v46 }
 0x426   : > { %v1468_v58 = vpop.xlane.xlu0 %1467 }
 0x427   : > { %v1514_v63 = vsub.f32 %v4197_v55, %v1468_v58  ;;  %v1515_v50 = vsub.f32 %v4199_v62, %v1468_v58 }
 0x429   : > { %v1546_v5 = vmul.f32 1.442695, %v1514_v63  ;;  %v1548_v9 = vmul.f32 1.442695, %v1515_v50 }
 0x42a   : > { %v1471_v49 = vpop.xlane.xlu0 %1470 }
 0x42b   : > { %2794 = vpow2.f32 %v1546_v5  ;;  %v1516_v13 = vsub.f32 %v4203_v4, %v1471_v49  ;;  %v1517_v14 = vsub.f32 %v4205_v10, %v1471_v49 }
 0x42c   : > { %2796 = vpow2.f32 %v1548_v9 }
 0x42d   : > { %v1550_v16 = vmul.f32 1.442695, %v1516_v13  ;;  %v1552_v21 = vmul.f32 1.442695, %v1517_v14 }
 0x42e   : > { %v1474_v26 = vpop.xlane.xlu1 %1473 }
 0x42f   : > { %2798 = vpow2.f32 %v1550_v16  ;;  %v1518_v27 = vsub.f32 %v4209_v17, %v1474_v26  ;;  %v1519_v56 = vsub.f32 %v4211_v20, %v1474_v26 }
 0x430   : > { %2800 = vpow2.f32 %v1552_v21 }
 0x431   : > { %v1554_v55 = vmul.f32 1.442695, %v1518_v27  ;;  %v1556_v62 = vmul.f32 1.442695, %v1519_v56 }
 0x432   : > { %v1477_v33 = vpop.xlane.xlu1 %1476 }
 0x433   : > { %2802 = vpow2.f32 %v1554_v55  ;;  %v1520_v35 = vsub.f32 %v4215_v28, %v1477_v33  ;;  %v1521_v4 = vsub.f32 %v4217_v32, %v1477_v33 }
 0x434   : > { %2804 = vpow2.f32 %v1556_v62 }
 0x435   : > { %v4301_v10 = vpop.eup %2794  ;;  %v1558_v39 = vmul.f32 1.442695, %v1520_v35  ;;  %v1560_v44 = vmul.f32 1.442695, %v1521_v4 }
 0x436   : > { %v4303_v42 = vpop.eup %2796  ;;  %v1480_v52 = vpop.xlane.xlu0 %1479 }
 0x437   : > { %2806 = vpow2.f32 %v1558_v39  ;;  %v1522_v17 = vsub.f32 %v4221_v37, %v1480_v52  ;;  %v1523_v20 = vsub.f32 %v4223_v43, %v1480_v52  ;;  %v1610_v59 = vadd.f32 %v4303_v42, %v4301_v10 }
 0x438   : > { %2808 = vpow2.f32 %v1560_v44 }
 0x439   : > { %v4309_v28 = vpop.eup %2798  ;;  %v1562_v32 = vmul.f32 1.442695, %v1522_v17  ;;  %v1564_v47 = vmul.f32 1.442695, %v1523_v20  ;;  %1611 = vadd.xlane.f32.xlu0 %v1610_v59 }
 0x43a   : > { %v4311_v2 = vpop.eup %2800  ;;  %v1483_v24 = vpop.xlane.xlu1 %1482 }
 0x43b   : > { %2810 = vpow2.f32 %v1562_v32  ;;  %v1524_v60 = vsub.f32 %v4227_v48, %v1483_v24  ;;  %v1525_v1 = vsub.f32 %v4229_v61, %v1483_v24  ;;  %v1613_v37 = vadd.f32 %v4311_v2, %v4309_v28 }
 0x43c   : > { %2812 = vpow2.f32 %v1564_v47 }
 0x43d   : > { %v4317_v43 = vpop.eup %2802  ;;  %v1566_v11 = vmul.f32 1.442695, %v1524_v60  ;;  %v1568_v15 = vmul.f32 1.442695, %v1525_v1  ;;  %1614 = vadd.xlane.f32.xlu1 %v1613_v37 }
 0x43e   : > { %v4319_v25 = vpop.eup %2804  ;;  %v1486_v29 = vpop.xlane.xlu0 %1485 }
 0x43f   : > { %2814 = vpow2.f32 %v1566_v11  ;;  %v1526_v34 = vsub.f32 %v4233_v3, %v1486_v29  ;;  %v1527_v40 = vsub.f32 %v4235_v8, %v1486_v29  ;;  %v1616_v48 = vadd.f32 %v4319_v25, %v4317_v43 }
 0x440   : > { %2816 = vpow2.f32 %v1568_v15 }
 0x441   : > { %v4325_v61 = vpop.eup %2806  ;;  %v1570_v46 = vmul.f32 1.442695, %v1526_v34  ;;  %v1572_v58 = vmul.f32 1.442695, %v1527_v40  ;;  %1617 = vadd.xlane.f32.xlu0 %v1616_v48 }
 0x442   : > { %v4327_v63 = vpop.eup %2808  ;;  %v1489_v50 = vpop.xlane.xlu1 %1488 }
 0x443   : > { %2818 = vpow2.f32 %v1570_v46  ;;  %v1528_v5 = vsub.f32 %v4239_v12, %v1489_v50  ;;  %v1529_v9 = vsub.f32 %v4241_v54, %v1489_v50  ;;  %v1619_v3 = vadd.f32 %v4327_v63, %v4325_v61 }
 0x444   : > { %2820 = vpow2.f32 %v1572_v58 }
 0x445   : > { %v4333_v8 = vpop.eup %2810  ;;  %v1574_v49 = vmul.f32 1.442695, %v1528_v5  ;;  %v1576_v13 = vmul.f32 1.442695, %v1529_v9  ;;  %1620 = vadd.xlane.f32.xlu1 %v1619_v3 }
 0x446   : > { %v4335_v14 = vpop.eup %2812  ;;  %v1492_v16 = vpop.xlane.xlu0 %1491 }
 0x447   : > { %2822 = vpow2.f32 %v1574_v49  ;;  %v1530_v21 = vsub.f32 %v4245_v18, %v1492_v16  ;;  %v1531_v26 = vsub.f32 %v4247_v22, %v1492_v16  ;;  %v1622_v12 = vadd.f32 %v4335_v14, %v4333_v8 }
 0x448   : > { %2824 = vpow2.f32 %v1576_v13 }
 0x449   : > { %v4341_v54 = vpop.eup %2814  ;;  %v1578_v27 = vmul.f32 1.442695, %v1530_v21  ;;  %v1580_v56 = vmul.f32 1.442695, %v1531_v26  ;;  %1623 = vadd.xlane.f32.xlu0 %v1622_v12 }
 0x44a   : > { %v4343_v55 = vpop.eup %2816  ;;  %v1495_v62 = vpop.xlane.xlu1 %1494 }
 0x44b   : > { %2826 = vpow2.f32 %v1578_v27  ;;  %v1532_v33 = vsub.f32 %v4251_v30, %v1495_v62  ;;  %v1533_v35 = vsub.f32 %v4253_v31, %v1495_v62  ;;  %v1625_v18 = vadd.f32 %v4343_v55, %v4341_v54 }
 0x44c   : > { %2828 = vpow2.f32 %v1580_v56 }
 0x44d   : > { %v4349_v22 = vpop.eup %2818  ;;  %v1582_v4 = vmul.f32 1.442695, %v1532_v33  ;;  %v1584_v39 = vmul.f32 1.442695, %v1533_v35  ;;  %1626 = vadd.xlane.f32.xlu1 %v1625_v18 }
 0x44e   : > { %v4351_v44 = vpop.eup %2820  ;;  %v1498_v52 = vpop.xlane.xlu0 %1497 }
 0x44f   : > { %2830 = vpow2.f32 %v1582_v4  ;;  %v1534_v17 = vsub.f32 %v4257_v38, %v1498_v52  ;;  %v1535_v20 = vsub.f32 %v4259_v41, %v1498_v52  ;;  %v1628_v30 = vadd.f32 %v4351_v44, %v4349_v22 }
 0x450   : > { %2832 = vpow2.f32 %v1584_v39 }
 0x451   : > { %v4357_v31 = vpop.eup %2822  ;;  %v1586_v59 = vmul.f32 1.442695, %v1534_v17  ;;  %v1588_v32 = vmul.f32 1.442695, %v1535_v20  ;;  %1629 = vadd.xlane.f32.xlu0 %v1628_v30 }
 0x452   : > { %v4359_v47 = vpop.eup %2824  ;;  %v1501_v24 = vpop.xlane.xlu1 %1500 }
 0x453   : > { %2834 = vpow2.f32 %v1586_v59  ;;  %v1536_v60 = vsub.f32 %v4263_v51, %v1501_v24  ;;  %v1537_v1 = vsub.f32 %v4265_v57, %v1501_v24  ;;  %v1631_v38 = vadd.f32 %v4359_v47, %v4357_v31 }
 0x454   : > { %2836 = vpow2.f32 %v1588_v32 }
 0x455   : > { %v4365_v41 = vpop.eup %2826  ;;  %v1590_v37 = vmul.f32 1.442695, %v1536_v60  ;;  %v1592_v11 = vmul.f32 1.442695, %v1537_v1  ;;  %1632 = vadd.xlane.f32.xlu1 %v1631_v38  ;;  %v1080_v1 = vld [vmem:[%s4423_s23] sm:$0xff]  ;;  %v1081_v38 = vld [vmem:[%s4423_s23 + $0x8] sm:$0xff] }
 0x456   : > { %v4367_v15 = vpop.eup %2828  ;;  %v1504_v29 = vpop.xlane.xlu0 %1503 }
 0x457   : > { %2838 = vpow2.f32 %v1590_v37  ;;  %v1538_v34 = vsub.f32 %v4269_v53, %v1504_v29  ;;  %v1539_v40 = vsub.f32 %v4271_v23, %v1504_v29  ;;  %v1634_v51 = vadd.f32 %v4367_v15, %v4365_v41  ;;  %v1082_v37 = vld [vmem:[%s4423_s23 + $0x10] sm:$0xff]  ;;  %v1083_v29 = vld [vmem:[%s4423_s23 + $0x18] sm:$0xff] }
 0x458   : > { %2840 = vpow2.f32 %v1592_v11  ;;  %v2630_v11 = vpack.c.bf16 %v1081_v38, %v1080_v1 }
 0x459   : > { %v4373_v57 = vpop.eup %2830  ;;  %v1594_v48 = vmul.f32 1.442695, %v1538_v34  ;;  %v1596_v46 = vmul.f32 1.442695, %v1539_v40  ;;  %1635 = vadd.xlane.f32.xlu0 %v1634_v51  ;;  %v2634_v34 = vpack.c.bf16 %v1083_v29, %v1082_v37  ;;  %v1084_v40 = vld [vmem:[%s4423_s23 + $0x20] sm:$0xff]  ;;  %v1085_v51 = vld [vmem:[%s4423_s23 + $0x28] sm:$0xff] }
 0x45a   : > { %v4375_v58 = vpop.eup %2832  ;;  %v1507_v50 = vpop.xlane.xlu1 %1506  ;;  %2631 = vmatprep.subr.bf16.mxu1 %v2630_v11 }
 0x45b   : > { %2842 = vpow2.f32 %v1594_v48  ;;  %v1540_v5 = vsub.f32 %v4275_v0, %v1507_v50  ;;  %v1541_v9 = vsub.f32 %v4277_v6, %v1507_v50  ;;  %v1637_v53 = vadd.f32 %v4375_v58, %v4373_v57  ;;  %2633 = vmatpush3.bf16.msra.mxu1 %v2630_v11  ;;  %v1087_v50 = vld [vmem:[%s4423_s23 + $0x38] sm:$0xff] }
 0x45c   : > { %2844 = vpow2.f32 %v1596_v46  ;;  %2635 = vmatprep.subr.bf16.mxu1 %v2634_v34  ;;  %v2638_v48 = vpack.c.bf16 %v1085_v51, %v1084_v40  ;;  %v1086_v46 = vld [vmem:[%s4423_s23 + $0x30] sm:$0xff] }
 0x45d   : > { %v4381_v23 = vpop.eup %2834  ;;  %v1598_v3 = vmul.f32 1.442695, %v1540_v5  ;;  %v1600_v49 = vmul.f32 1.442695, %v1541_v9  ;;  %1638 = vadd.xlane.f32.xlu1 %v1637_v53  ;;  %v2642_v5 = vpack.c.bf16 %v1087_v50, %v1086_v46  ;;  %v1088_v9 = vld [vmem:[%s4423_s23 + $0x40] sm:$0xff]  ;;  %v1089_v53 = vld [vmem:[%s4423_s23 + $0x48] sm:$0xff] }
 0x45e   : > { %v4383_v13 = vpop.eup %2836  ;;  %v1510_v16 = vpop.xlane.xlu0 %1509 }
 0x45f   : > { %2846 = vpow2.f32 %v1598_v3  ;;  %v1542_v21 = vsub.f32 %v4281_v19, %v1510_v16  ;;  %v1543_v26 = vsub.f32 %v4283_v7, %v1510_v16  ;;  %v1640_v0 = vadd.f32 %v4383_v13, %v4381_v23  ;;  %2637 = vmatpush3.bf16.msra.mxu1 %v2634_v34  ;;  %v1091_v16 = vld [vmem:[%s4423_s23 + $0x58] sm:$0xff] }
 0x460   : > { %2848 = vpow2.f32 %v1600_v49  ;;  %2639 = vmatprep.subr.bf16.mxu1 %v2638_v48  ;;  %v2646_v3 = vpack.c.bf16 %v1089_v53, %v1088_v9  ;;  %v1090_v49 = vld [vmem:[%s4423_s23 + $0x50] sm:$0xff] }
 0x461   : > { %v4389_v6 = vpop.eup %2838  ;;  %v1602_v12 = vmul.f32 1.442695, %v1542_v21  ;;  %v1604_v27 = vmul.f32 1.442695, %v1543_v26  ;;  %1641 = vadd.xlane.f32.xlu0 %v1640_v0  ;;  %v2650_v21 = vpack.c.bf16 %v1091_v16, %v1090_v49  ;;  %v1092_v26 = vld [vmem:[%s4423_s23 + $0x60] sm:$0xff]  ;;  %v1093_v0 = vld [vmem:[%s4423_s23 + $0x68] sm:$0xff] }
 0x462   : > { %v4391_v56 = vpop.eup %2840  ;;  %v1513_v62 = vpop.xlane.xlu1 %1512 }
 0x463   : > { %2850 = vpow2.f32 %v1602_v12  ;;  %v1544_v33 = vsub.f32 %v4287_v36, %v1513_v62  ;;  %v1545_v35 = vsub.f32 %v4289_v45, %v1513_v62  ;;  %v1643_v19 = vadd.f32 %v4391_v56, %v4389_v6  ;;  %2641 = vmatpush3.bf16.msra.mxu1 %v2638_v48 }
 0x464   : > { %2852 = vpow2.f32 %v1604_v27  ;;  %2643 = vmatprep.subr.bf16.mxu1 %v2642_v5  ;;  %v2654_v12 = vpack.c.bf16 %v1093_v0, %v1092_v26 }
 0x465   : > { %v4397_v7 = vpop.eup %2842  ;;  %v1606_v18 = vmul.f32 1.442695, %v1544_v33  ;;  %v1608_v4 = vmul.f32 1.442695, %v1545_v35  ;;  %1644 = vadd.xlane.f32.xlu1 %v1643_v19 }
 0x466   : > { %v4399_v39 = vpop.eup %2844 }
 0x467   : > { %2854 = vpow2.f32 %v1606_v18  ;;  %v1646_v52 = vadd.f32 %v4399_v39, %v4397_v7  ;;  %2645 = vmatpush3.bf16.msra.mxu1 %v2642_v5 }
 0x468   : > { %2856 = vpow2.f32 %v1608_v4  ;;  %2647 = vmatprep.subr.bf16.mxu1 %v2646_v3 }
 0x469   : > { %v4403_v36 = vpop.eup %2846  ;;  %1647 = vadd.xlane.f32.xlu0 %v1646_v52  ;;  %v1094_v52 = vld [vmem:[%s4423_s23 + $0x70] sm:$0xff] }
 0x46a   : > { %v4405_v45 = vpop.eup %2848 }
 0x46b   : > { %v1649_v17 = vadd.f32 %v4405_v45, %v4403_v36  ;;  %2649 = vmatpush3.bf16.msra.mxu1 %v2646_v3 }
 0x46c   : > { %2651 = vmatprep.subr.bf16.mxu1 %v2650_v21 }
 0x46d   : > { %v4409_v20 = vpop.eup %2850  ;;  %1650 = vadd.xlane.f32.xlu1 %v1649_v17  ;;  %v1095_v17 = vld [vmem:[%s4423_s23 + $0x78] sm:$0xff] }
 0x46e   : > { %v4411_v30 = vpop.eup %2852 }
 0x46f   : > { %v1652_v59 = vadd.f32 %v4411_v30, %v4409_v20  ;;  %2653 = vmatpush3.bf16.msra.mxu1 %v2650_v21 }
 0x470   : > { %2655 = vmatprep.subr.bf16.mxu1 %v2654_v12 }
 0x471   : > { %v4415_v32 = vpop.eup %2854  ;;  %1653 = vadd.xlane.f32.xlu0 %v1652_v59  ;;  %v2658_v59 = vpack.c.bf16 %v1095_v17, %v1094_v52 }
 0x472   : > { %v4417_v24 = vpop.eup %2856 }
 0x473   : > { %v1655_v60 = vadd.f32 %v4417_v24, %v4415_v32  ;;  %2657 = vmatpush3.bf16.msra.mxu1 %v2654_v12 }
 0x474   : > { %2659 = vmatprep.subr.bf16.mxu1 %v2658_v59 }
 0x475   : > { %1656 = vadd.xlane.f32.xlu1 %v1655_v60 }
 0x477   : > { %2661 = vmatpush3.bf16.msra.mxu1 %v2658_v59 }
 0x4c6   : > { %v1612_v27 = vpop.xlane.xlu0 %1611 }
 0x4c7   : > { %2858 = vrcp.f32 %v1612_v27 }
 0x4ca   : > { %v1615_v62 = vpop.xlane.xlu1 %1614 }
 0x4cb   : > { %2860 = vrcp.f32 %v1615_v62 }
 0x4ce   : > { %v1618_v33 = vpop.xlane.xlu0 %1617 }
 0x4cf   : > { %2862 = vrcp.f32 %v1618_v33 }
 0x4d1   : > { %v2859_v35 = vpop.eup %2858 }
 0x4d2   : > { %v1621_v19 = vpop.xlane.xlu1 %1620  ;;  %v1674_v18 = vmul.f32 %v2859_v35, %v4301_v10  ;;  %v1675_v4 = vmul.f32 %v2859_v35, %v4303_v42 }
 0x4d3   : > { %2864 = vrcp.f32 %v1621_v19 }
 0x4d4   : > { %1738 = vxpose.xlu0.b32.start [1/16] %v1674_v18, 128  ;;  %1706 = vst [vmem:[%s3302_s7] sm:$0xff] %v1674_v18  ;;  %1707 = vst [vmem:[%s3302_s7 + $0x8] sm:$0xff] %v1675_v4  ;;  %1770 = vxpose.xlu1.b32.start [1/16] %v1675_v4, 128 }
 0x4d5   : > { %v2861_v60 = vpop.eup %2860 }
 0x4d6   : > { %v1624_v1 = vpop.xlane.xlu0 %1623  ;;  %v1677_v38 = vmul.f32 %v2861_v60, %v4311_v2  ;;  %v1676_v10 = vmul.f32 %v2861_v60, %v4309_v28 }
 0x4d7   : > { %2866 = vrcp.f32 %v1624_v1 }
 0x4d8   : > { %1771 = vxpose.xlu1.b32.cont [2/16] %v1677_v38, 128  ;;  %1709 = vst [vmem:[%s3302_s7 + $0x18] sm:$0xff] %v1677_v38  ;;  %1739 = vxpose.xlu0.b32.cont [2/16] %v1676_v10, 128  ;;  %1708 = vst [vmem:[%s3302_s7 + $0x10] sm:$0xff] %v1676_v10 }
 0x4d9   : > { %v2863_v42 = vpop.eup %2862 }
 0x4da   : > { %v1627_v37 = vpop.xlane.xlu1 %1626  ;;  %v1679_v11 = vmul.f32 %v2863_v42, %v4319_v25  ;;  %v1678_v29 = vmul.f32 %v2863_v42, %v4317_v43 }
 0x4db   : > { %2868 = vrcp.f32 %v1627_v37 }
 0x4dc   : > { %1711 = vst [vmem:[%s3302_s7 + $0x28] sm:$0xff] %v1679_v11  ;;  %1772 = vxpose.xlu1.b32.cont [3/16] %v1679_v11, 128  ;;  %1710 = vst [vmem:[%s3302_s7 + $0x20] sm:$0xff] %v1678_v29  ;;  %1740 = vxpose.xlu0.b32.cont [3/16] %v1678_v29, 128 }
 0x4dd   : > { %v2865_v28 = vpop.eup %2864 }
 0x4de   : > { %v1630_v2 = vpop.xlane.xlu0 %1629  ;;  %v1681_v34 = vmul.f32 %v2865_v28, %v4327_v63  ;;  %v1680_v40 = vmul.f32 %v2865_v28, %v4325_v61 }
 0x4df   : > { %2870 = vrcp.f32 %v1630_v2 }
 0x4e0   : > { %1773 = vxpose.xlu1.b32.cont [4/16] %v1681_v34, 128  ;;  %1713 = vst [vmem:[%s3302_s7 + $0x38] sm:$0xff] %v1681_v34  ;;  %1741 = vxpose.xlu0.b32.cont [4/16] %v1680_v40, 128  ;;  %1712 = vst [vmem:[%s3302_s7 + $0x30] sm:$0xff] %v1680_v40 }
 0x4e1   : > { %v2867_v43 = vpop.eup %2866 }
 0x4e2   : > { %v1633_v25 = vpop.xlane.xlu1 %1632  ;;  %v1683_v51 = vmul.f32 %v2867_v43, %v4335_v14  ;;  %v1682_v48 = vmul.f32 %v2867_v43, %v4333_v8 }
 0x4e3   : > { %2872 = vrcp.f32 %v1633_v25 }
 0x4e4   : > { %1715 = vst [vmem:[%s3302_s7 + $0x48] sm:$0xff] %v1683_v51  ;;  %1774 = vxpose.xlu1.b32.cont [5/16] %v1683_v51, 128  ;;  %1714 = vst [vmem:[%s3302_s7 + $0x40] sm:$0xff] %v1682_v48  ;;  %1742 = vxpose.xlu0.b32.cont [5/16] %v1682_v48, 128 }
 0x4e5   : > { %v2869_v61 = vpop.eup %2868 }
 0x4e6   : > { %v1636_v63 = vpop.xlane.xlu0 %1635  ;;  %v1685_v46 = vmul.f32 %v2869_v61, %v4343_v55  ;;  %v1684_v50 = vmul.f32 %v2869_v61, %v4341_v54 }
 0x4e7   : > { %2874 = vrcp.f32 %v1636_v63 }
 0x4e8   : > { %1775 = vxpose.xlu1.b32.cont [6/16] %v1685_v46, 128  ;;  %1717 = vst [vmem:[%s3302_s7 + $0x58] sm:$0xff] %v1685_v46  ;;  %1743 = vxpose.xlu0.b32.cont [6/16] %v1684_v50, 128  ;;  %1716 = vst [vmem:[%s3302_s7 + $0x50] sm:$0xff] %v1684_v50 }
 0x4e9   : > { %v2871_v8 = vpop.eup %2870 }
 0x4ea   : > { %v1639_v14 = vpop.xlane.xlu1 %1638  ;;  %v1687_v5 = vmul.f32 %v2871_v8, %v4351_v44  ;;  %v1686_v9 = vmul.f32 %v2871_v8, %v4349_v22 }
 0x4eb   : > { %2876 = vrcp.f32 %v1639_v14 }
 0x4ec   : > { %1719 = vst [vmem:[%s3302_s7 + $0x68] sm:$0xff] %v1687_v5  ;;  %1776 = vxpose.xlu1.b32.cont [7/16] %v1687_v5, 128  ;;  %1718 = vst [vmem:[%s3302_s7 + $0x60] sm:$0xff] %v1686_v9  ;;  %1744 = vxpose.xlu0.b32.cont [7/16] %v1686_v9, 128 }
 0x4ed   : > { %v2873_v54 = vpop.eup %2872 }
 0x4ee   : > { %v1642_v55 = vpop.xlane.xlu0 %1641  ;;  %v1689_v53 = vmul.f32 %v2873_v54, %v4359_v47  ;;  %v1688_v3 = vmul.f32 %v2873_v54, %v4357_v31 }
 0x4ef   : > { %2878 = vrcp.f32 %v1642_v55 }
 0x4f0   : > { %1777 = vxpose.xlu1.b32.cont [8/16] %v1689_v53, 128  ;;  %1721 = vst [vmem:[%s3302_s7 + $0x78] sm:$0xff] %v1689_v53  ;;  %1745 = vxpose.xlu0.b32.cont [8/16] %v1688_v3, 128  ;;  %1720 = vst [vmem:[%s3302_s7 + $0x70] sm:$0xff] %v1688_v3 }
 0x4f1   : > { %v2875_v22 = vpop.eup %2874 }
 0x4f2   : > { %v1645_v44 = vpop.xlane.xlu1 %1644  ;;  %v1691_v49 = vmul.f32 %v2875_v22, %v4367_v15  ;;  %v1690_v16 = vmul.f32 %v2875_v22, %v4365_v41 }
 0x4f3   : > { %2880 = vrcp.f32 %v1645_v44 }
 0x4f4   : > { %1723 = vst [vmem:[%s3302_s7 + $0x88] sm:$0xff] %v1691_v49  ;;  %1778 = vxpose.xlu1.b32.cont [9/16] %v1691_v49, 128  ;;  %1722 = vst [vmem:[%s3302_s7 + $0x80] sm:$0xff] %v1690_v16  ;;  %1746 = vxpose.xlu0.b32.cont [9/16] %v1690_v16, 128 }
 0x4f5   : > { %v2877_v31 = vpop.eup %2876 }
 0x4f6   : > { %v1648_v47 = vpop.xlane.xlu0 %1647  ;;  %v1693_v21 = vmul.f32 %v2877_v31, %v4375_v58  ;;  %v1692_v26 = vmul.f32 %v2877_v31, %v4373_v57 }
 0x4f7   : > { %2882 = vrcp.f32 %v1648_v47 }
 0x4f8   : > { %1779 = vxpose.xlu1.b32.cont [10/16] %v1693_v21, 128  ;;  %1725 = vst [vmem:[%s3302_s7 + $0x98] sm:$0xff] %v1693_v21  ;;  %1747 = vxpose.xlu0.b32.cont [10/16] %v1692_v26, 128  ;;  %1724 = vst [vmem:[%s3302_s7 + $0x90] sm:$0xff] %v1692_v26 }
 0x4f9   : > { %v2879_v41 = vpop.eup %2878 }
 0x4fa   : > { %v1651_v15 = vpop.xlane.xlu1 %1650  ;;  %v1695_v0 = vmul.f32 %v2879_v41, %v4383_v13  ;;  %v1694_v12 = vmul.f32 %v2879_v41, %v4381_v23 }
 0x4fb   : > { %2884 = vrcp.f32 %v1651_v15 }
 0x4fc   : > { %1727 = vst [vmem:[%s3302_s7 + $0xa8] sm:$0xff] %v1695_v0  ;;  %1780 = vxpose.xlu1.b32.cont [11/16] %v1695_v0, 128  ;;  %1726 = vst [vmem:[%s3302_s7 + $0xa0] sm:$0xff] %v1694_v12  ;;  %1748 = vxpose.xlu0.b32.cont [11/16] %v1694_v12, 128 }
 0x4fd   : > { %v2881_v57 = vpop.eup %2880 }
 0x4fe   : > { %v1654_v58 = vpop.xlane.xlu0 %1653  ;;  %v1697_v27 = vmul.f32 %v2881_v57, %v4391_v56  ;;  %v1696_v62 = vmul.f32 %v2881_v57, %v4389_v6 }
 0x4ff   : > { %2886 = vrcp.f32 %v1654_v58 }
 0x500   : > { %1781 = vxpose.xlu1.b32.cont [12/16] %v1697_v27, 128  ;;  %1729 = vst [vmem:[%s3302_s7 + $0xb8] sm:$0xff] %v1697_v27  ;;  %1749 = vxpose.xlu0.b32.cont [12/16] %v1696_v62, 128  ;;  %1728 = vst [vmem:[%s3302_s7 + $0xb0] sm:$0xff] %v1696_v62 }
 0x501   : > { %v2883_v23 = vpop.eup %2882 }
 0x502   : > { %v1657_v13 = vpop.xlane.xlu1 %1656  ;;  %v1699_v33 = vmul.f32 %v2883_v23, %v4399_v39  ;;  %v1698_v35 = vmul.f32 %v2883_v23, %v4397_v7 }
 0x503   : > { %2888 = vrcp.f32 %v1657_v13 }
 0x504   : > { %1731 = vst [vmem:[%s3302_s7 + $0xc8] sm:$0xff] %v1699_v33  ;;  %1782 = vxpose.xlu1.b32.cont [13/16] %v1699_v33, 128  ;;  %1730 = vst [vmem:[%s3302_s7 + $0xc0] sm:$0xff] %v1698_v35  ;;  %1750 = vxpose.xlu0.b32.cont [13/16] %v1698_v35, 128 }
 0x505   : > { %v2885_v6 = vpop.eup %2884 }
 0x506   : > { %v1701_v56 = vmul.f32 %v2885_v6, %v4405_v45  ;;  %v1700_v19 = vmul.f32 %v2885_v6, %v4403_v36 }
 0x508   : > { %1783 = vxpose.xlu1.b32.cont [14/16] %v1701_v56, 128  ;;  %1733 = vst [vmem:[%s3302_s7 + $0xd8] sm:$0xff] %v1701_v56  ;;  %1751 = vxpose.xlu0.b32.cont [14/16] %v1700_v19, 128  ;;  %1732 = vst [vmem:[%s3302_s7 + $0xd0] sm:$0xff] %v1700_v19 }
 0x509   : > { %v2887_v39 = vpop.eup %2886 }
 0x50a   : > { %v1703_v7 = vmul.f32 %v2887_v39, %v4411_v30  ;;  %v1702_v18 = vmul.f32 %v2887_v39, %v4409_v20 }
 0x50c   : > { %1735 = vst [vmem:[%s3302_s7 + $0xe8] sm:$0xff] %v1703_v7  ;;  %1784 = vxpose.xlu1.b32.cont [15/16] %v1703_v7, 128  ;;  %1734 = vst [vmem:[%s3302_s7 + $0xe0] sm:$0xff] %v1702_v18  ;;  %1752 = vxpose.xlu0.b32.cont [15/16] %v1702_v18, 128 }
 0x50d   : > { %v2889_v4 = vpop.eup %2888 }
 0x50e   : > { %v1705_v45 = vmul.f32 %v2889_v4, %v4417_v24  ;;  %v1704_v36 = vmul.f32 %v2889_v4, %v4415_v32 }
 0x510   : > { %1785 = vxpose.xlu1.b32.end [16/16] %v1705_v45, 128  ;;  %1737 = vst [vmem:[%s3302_s7 + $0xf8] sm:$0xff] %v1705_v45  ;;  %1753 = vxpose.xlu0.b32.end [16/16] %v1704_v36, 128  ;;  %1736 = vst [vmem:[%s3302_s7 + $0xf0] sm:$0xff] %v1704_v36  ;;  %s2924_s7 = sshll.u32 %s3082_s21, 4  ;;  %s2925_s7 = int_to_ptr.vmem [resolvable:$false] %s2924_s7 }
 0x511   : > { %s2926_s23 = scalar_lea.vmem %s2925_s7, 8192  ;;  %p2927_p5 = scmp.lt.s32.totalorder %s4513_s20, %s2925_s7 }
 0x512   : > { %p2928_p8 = scmp.lt.s32.totalorder %s2926_s23, %s2920_s28 }
 0x514   : > { %p2929_p13 = por %p2928_p8, %p2927_p5 }
 0x516   : > { %p2930_p3 = pnand %p2929_p13, %p2923_p0 }
 0x554   : > { %v1754_v52 = vpop.trf.xlu0  ;;  %v1786_v17 = vpop.trf.xlu1 }
 0x555   : > { %2502 = vmatprep.mubr.f32.mxu1 %v1754_v52 }
 0x558   : > { %v1755_v59 = vpop.trf.xlu0  ;;  %v1787_v30 = vpop.trf.xlu1 }
 0x559   : > { %2503 = vmatmul.mubr.f32.vlgmr.msra.gmra.mrb[0].mxu1 %v1755_v59 }
 0x55c   : > { %v1756_v20 = vpop.trf.xlu0  ;;  %v1788_v1 = vpop.trf.xlu1 }
 0x55d   : > { %2505 = vmatprep.mubr.f32.mxu1 %v1756_v20 }
 0x560   : > { %v1757_v60 = vpop.trf.xlu0  ;;  %v1789_v24 = vpop.trf.xlu1 }
 0x561   : > { %2506 = vmatmul.mubr.f32.gmra.mrb[2].mxu1 %v1757_v60 }
 0x564   : > { %v1758_v38 = vpop.trf.xlu0  ;;  %v1790_v42 = vpop.trf.xlu1 }
 0x565   : > { %2508 = vmatprep.mubr.f32.mxu1 %v1758_v38 }
 0x568   : > { %v1759_v10 = vpop.trf.xlu0  ;;  %v1791_v11 = vpop.trf.xlu1 }
 0x569   : > { %2509 = vmatmul.mubr.f32.gmra.mrb[4].mxu1 %v1759_v10 }
 0x56c   : > { %v1760_v32 = vpop.trf.xlu0  ;;  %v1792_v2 = vpop.trf.xlu1 }
 0x56d   : > { %2511 = vmatprep.mubr.f32.mxu1 %v1760_v32 }
 0x570   : > { %v1761_v37 = vpop.trf.xlu0  ;;  %v1793_v40 = vpop.trf.xlu1 }
 0x571   : > { %2512 = vmatmul.mubr.f32.gmra.mrb[6].mxu1 %v1761_v37 }
 0x574   : > { %v1762_v29 = vpop.trf.xlu0  ;;  %v1794_v51 = vpop.trf.xlu1 }
 0x575   : > { %2514 = vmatprep.mubr.f32.mxu1 %v1762_v29 }
 0x578   : > { %v1763_v28 = vpop.trf.xlu0  ;;  %v1795_v61 = vpop.trf.xlu1 }
 0x579   : > { %2515 = vmatmul.mubr.f32.gmra.mrb[8].mxu1 %v1763_v28 }
 0x57c   : > { %v1764_v34 = vpop.trf.xlu0  ;;  %v1796_v50 = vpop.trf.xlu1 }
 0x57d   : > { %2517 = vmatprep.mubr.f32.mxu1 %v1764_v34 }
 0x580   : > { %v1765_v43 = vpop.trf.xlu0  ;;  %v1797_v8 = vpop.trf.xlu1 }
 0x581   : > { %2518 = vmatmul.mubr.f32.gmra.mrb[10].mxu1 %v1765_v43 }
 0x584   : > { %v1766_v25 = vpop.trf.xlu0  ;;  %v1798_v14 = vpop.trf.xlu1 }
 0x585   : > { %2520 = vmatprep.mubr.f32.mxu1 %v1766_v25 }
 0x588   : > { %v1767_v48 = vpop.trf.xlu0  ;;  %v1799_v5 = vpop.trf.xlu1 }
 0x589   : > { %2521 = vmatmul.mubr.f32.gmra.mrb[12].mxu1 %v1767_v48 }
 0x58c   : > { %v1768_v63 = vpop.trf.xlu0  ;;  %v1800_v9 = vpop.trf.xlu1 }
 0x58d   : > { %2523 = vmatprep.mubr.f32.mxu1 %v1768_v63 }
 0x590   : > { %v1769_v46 = vpop.trf.xlu0  ;;  %v1801_v54 = vpop.trf.xlu1 }
 0x591   : > { %2524 = vmatmul.mubr.f32.gmra.mrb[14].mxu1 %v1769_v46 }
 0x592   : > { %2526 = vmatprep.mubr.f32.mxu1 %v1786_v17 }
 0x595   : > { %2527 = vmatmul.mubr.f32.gmra.mrb[16].mxu1 %v1787_v30 }
 0x596   : > { %2529 = vmatprep.mubr.f32.mxu1 %v1788_v1 }
 0x599   : > { %2530 = vmatmul.mubr.f32.gmra.mrb[18].mxu1 %v1789_v24 }
 0x59a   : > { %2532 = vmatprep.mubr.f32.mxu1 %v1790_v42 }
 0x59d   : > { %2533 = vmatmul.mubr.f32.gmra.mrb[20].mxu1 %v1791_v11 }
 0x59e   : > { %2535 = vmatprep.mubr.f32.mxu1 %v1792_v2 }
 0x5a1   : > { %2536 = vmatmul.mubr.f32.gmra.mrb[22].mxu1 %v1793_v40 }
 0x5a2   : > { %2538 = vmatprep.mubr.f32.mxu1 %v1794_v51 }
 0x5a5   : > { %2539 = vmatmul.mubr.f32.gmra.mrb[24].mxu1 %v1795_v61 }
 0x5a6   : > { %2541 = vmatprep.mubr.f32.mxu1 %v1796_v50 }
 0x5a9   : > { %2542 = vmatmul.mubr.f32.gmra.mrb[26].mxu1 %v1797_v8 }
 0x5aa   : > { %2544 = vmatprep.mubr.f32.mxu1 %v1798_v14 }
 0x5ad   : > { %2545 = vmatmul.mubr.f32.gmra.mrb[28].mxu1 %v1799_v5 }
 0x5ae   : > { %2547 = vmatprep.mubr.f32.mxu1 %v1800_v9 }
 0x5b1   : > { %2548 = vmatmul.mubr.f32.gmra.mrb[30].mxu1 %v1801_v54 }
 0x5b2   : > { %2933 = shalt.err (!%p2930_p3)
}
 0x5b3   : > { %s2934_s5 = scalar_lea.hbm %s4511_s24, 4096  ;;  %s2938_s12 = scalar_lea.hbm %s4682_s4, 16384 }
 0x5b4   : > { %p2935_p1 = scmp.ne.s32.totalorder %s4511_s24, %s2934_s5  ;;  %p2939_p4 = scmp.lt.u32.totalorder %s4511_s24, %s4682_s4 }
 0x5b5   : > { %p2940_p12 = scmp.lt.u32.totalorder %s2938_s12, %s2934_s5  ;;  %p2942_p9 = scmp.lt.u32.totalorder %s2934_s5, %s4511_s24 }
 0x5b6   : > { %p2936_p7 = pnand %p2935_p1, %p4714_p2 }
 0x5b7   : > { %p2941_p10 = por %p2940_p12, %p2939_p4 }
 0x5b8   : > { %p2937_p11 = pneg %p2936_p7 }
 0x5b9   : > { %p2943_p6 = por %p2942_p9, %p2941_p10 }
 0x5bb   : > { %p2944_p0 = pnand %p2943_p6, %p2937_p11 }
 0x5bd   : > { %2947 = shalt.err (!%p2944_p0)
}
 0x5be   : > { %s3083_s13 = smov 256   ;;  %s3084_s28 = smov 16   ;;  %v2028_v55 = vld [vmem:[%s3300_s14 + $0x8] sm:$0xff]  ;;  %v2027_v53 = vld [vmem:[%s3300_s14] sm:$0xff]  ;;  %v2030_v16 = vld [vmem:[%s3300_s14 + $0x18] sm:$0xff] }
 0x5bf   : > { %2681 = dma.vmem_to_hbm [thread:$0]  (%p4714_p2), %s4513_s20, 4096, %s4511_s24, %s4517_s0, %s3083_s13, %s3083_s13, %s3084_s28  }
 0x5c0   : > { %v2029_v31 = vld [vmem:[%s3300_s14 + $0x10] sm:$0xff]  ;;  %v2032_v15 = vld [vmem:[%s3300_s14 + $0x28] sm:$0xff]  ;;  %v2031_v0 = vld [vmem:[%s3300_s14 + $0x20] sm:$0xff]  ;;  %s2356_s29 = sshll.u32 %s3062_s22, 12  ;;  %s2142_s20 = sshll.u32 %s3300_s14, 4  ;;  %s4610_s20 = int_to_ptr.vmem [resolvable:$true] %s2142_s20 }
 0x5c1   : > { %v2034_v62 = vld [vmem:[%s3300_s14 + $0x38] sm:$0xff]  ;;  %v2033_v23 = vld [vmem:[%s3300_s14 + $0x30] sm:$0xff]  ;;  %v2036_v56 = vld [vmem:[%s3300_s14 + $0x48] sm:$0xff]  ;;  %s4608_s21 = scalar_lea.hbm %s4681_s3, %s2356_s29  ;;  %s2124_s22 = scalar_lea.sflag [#allocation7], %s3287_s6 }
 0x5c2   : > { %v2035_v19 = vld [vmem:[%s3300_s14 + $0x40] sm:$0xff]  ;;  %v2038_v45 = vld [vmem:[%s3300_s14 + $0x58] sm:$0xff]  ;;  %v2037_v36 = vld [vmem:[%s3300_s14 + $0x50] sm:$0xff]  ;;  %s2948_s7 = scalar_lea.vmem %s4610_s20, 4096  ;;  %p4715_p5 = scmp.ne.s32.totalorder %s4702_s9, 0 }
 0x5c3   : > { %v2040_v20 = vld [vmem:[%s3300_s14 + $0x68] sm:$0xff]  ;;  %v2039_v60 = vld [vmem:[%s3300_s14 + $0x60] sm:$0xff]  ;;  %v2042_v32 = vld [vmem:[%s3300_s14 + $0x78] sm:$0xff]  ;;  %p2949_p2 = scmp.ne.s32.totalorder %s4610_s20, %s2948_s7  ;;  %s3085_s23 = smov [#allocation8]  }
 0x5c4   : > { %v2041_v42 = vld [vmem:[%s3300_s14 + $0x70] sm:$0xff]  ;;  %v2044_v2 = vld [vmem:[%s3300_s14 + $0x88] sm:$0xff]  ;;  %v2043_v34 = vld [vmem:[%s3300_s14 + $0x80] sm:$0xff]  ;;  %s2952_s5 = sshll.u32 %s3085_s23, 4  ;;  %s2953_s5 = int_to_ptr.vmem [resolvable:$false] %s2952_s5 }
 0x5c5   : > { %v2046_v48 = vld [vmem:[%s3300_s14 + $0x98] sm:$0xff]  ;;  %v2045_v61 = vld [vmem:[%s3300_s14 + $0x90] sm:$0xff]  ;;  %v2048_v14 = vld [vmem:[%s3300_s14 + $0xa8] sm:$0xff]  ;;  %p2950_p8 = pnand %p2949_p2, %p4715_p5  ;;  %s2954_s26 = scalar_lea.vmem %s2953_s5, 8192 }
 0x5c6   : > { %v2047_v5 = vld [vmem:[%s3300_s14 + $0xa0] sm:$0xff]  ;;  %p2955_p3 = scmp.lt.s32.totalorder %s4610_s20, %s2953_s5  ;;  %p2956_p1 = scmp.lt.s32.totalorder %s2954_s26, %s2948_s7 }
 0x5c7   : > { %p2951_p13 = pneg %p2950_p8 }
 0x5c8   : > { %p2957_p7 = por %p2956_p1, %p2955_p3 }
 0x5ca   : > { %p2958_p11 = pnand %p2957_p7, %p2951_p13 }
 0x62c   : > { %v2504_v3 = vpop.f32.mrb[0].mxu1 }
 0x62d   : > { %v2060_v22 = vadd.f32 %v2504_v3, %v2028_v55  ;;  %v1868_v44 = vpop.f32.mrb[1].mxu1  ;;  %v2050_v3 = vld [vmem:[%s3300_s14 + $0xb8] sm:$0xff] }
 0x62e   : > { %v2059_v49 = vadd.f32 %v2027_v53, %v1868_v44 }
 0x62f   : > { %2092 = vst [vmem:[%s3300_s14 + $0x8] sm:$0xff] %v2060_v22  ;;  %v2049_v22 = vld [vmem:[%s3300_s14 + $0xb0] sm:$0xff] }
 0x630   : > { %2091 = vst [vmem:[%s3300_s14] sm:$0xff] %v2059_v49 }
 0x634   : > { %v2507_v47 = vpop.f32.mrb[2].mxu1 }
 0x635   : > { %v2062_v21 = vadd.f32 %v2507_v47, %v2030_v16  ;;  %v1878_v26 = vpop.f32.mrb[3].mxu1  ;;  %v2052_v47 = vld [vmem:[%s3300_s14 + $0xc8] sm:$0xff] }
 0x636   : > { %v2061_v41 = vadd.f32 %v2029_v31, %v1878_v26 }
 0x637   : > { %2094 = vst [vmem:[%s3300_s14 + $0x18] sm:$0xff] %v2062_v21  ;;  %v2051_v21 = vld [vmem:[%s3300_s14 + $0xc0] sm:$0xff] }
 0x638   : > { %2093 = vst [vmem:[%s3300_s14 + $0x10] sm:$0xff] %v2061_v41 }
 0x63c   : > { %v2510_v12 = vpop.f32.mrb[4].mxu1 }
 0x63d   : > { %v2064_v57 = vadd.f32 %v2510_v12, %v2032_v15  ;;  %v1888_v58 = vpop.f32.mrb[5].mxu1  ;;  %v2054_v12 = vld [vmem:[%s3300_s14 + $0xd8] sm:$0xff] }
 0x63e   : > { %v2063_v27 = vadd.f32 %v2031_v0, %v1888_v58 }
 0x63f   : > { %2096 = vst [vmem:[%s3300_s14 + $0x28] sm:$0xff] %v2064_v57  ;;  %v2053_v57 = vld [vmem:[%s3300_s14 + $0xd0] sm:$0xff] }
 0x640   : > { %2095 = vst [vmem:[%s3300_s14 + $0x20] sm:$0xff] %v2063_v27 }
 0x644   : > { %v2513_v13 = vpop.f32.mrb[6].mxu1 }
 0x645   : > { %v2066_v33 = vadd.f32 %v2513_v13, %v2034_v62  ;;  %v1898_v35 = vpop.f32.mrb[7].mxu1  ;;  %v2056_v13 = vld [vmem:[%s3300_s14 + $0xe8] sm:$0xff] }
 0x646   : > { %v2065_v6 = vadd.f32 %v2033_v23, %v1898_v35 }
 0x647   : > { %2098 = vst [vmem:[%s3300_s14 + $0x38] sm:$0xff] %v2066_v33  ;;  %v2055_v33 = vld [vmem:[%s3300_s14 + $0xe0] sm:$0xff] }
 0x648   : > { %2097 = vst [vmem:[%s3300_s14 + $0x30] sm:$0xff] %v2065_v6 }
 0x64c   : > { %v2516_v39 = vpop.f32.mrb[8].mxu1 }
 0x64d   : > { %v2068_v7 = vadd.f32 %v2516_v39, %v2036_v56  ;;  %v1908_v18 = vpop.f32.mrb[9].mxu1  ;;  %v2058_v39 = vld [vmem:[%s3300_s14 + $0xf8] sm:$0xff] }
 0x64e   : > { %v2067_v4 = vadd.f32 %v2035_v19, %v1908_v18 }
 0x64f   : > { %2100 = vst [vmem:[%s3300_s14 + $0x48] sm:$0xff] %v2068_v7  ;;  %v2057_v7 = vld [vmem:[%s3300_s14 + $0xf0] sm:$0xff] }
 0x650   : > { %2099 = vst [vmem:[%s3300_s14 + $0x40] sm:$0xff] %v2067_v4 }
 0x654   : > { %v2519_v52 = vpop.f32.mrb[10].mxu1 }
 0x655   : > { %v2070_v17 = vadd.f32 %v2519_v52, %v2038_v45  ;;  %v1918_v59 = vpop.f32.mrb[11].mxu1 }
 0x656   : > { %v2069_v30 = vadd.f32 %v2037_v36, %v1918_v59 }
 0x657   : > { %2102 = vst [vmem:[%s3300_s14 + $0x58] sm:$0xff] %v2070_v17 }
 0x658   : > { %2101 = vst [vmem:[%s3300_s14 + $0x50] sm:$0xff] %v2069_v30 }
 0x65c   : > { %v2522_v1 = vpop.f32.mrb[12].mxu1 }
 0x65d   : > { %v2072_v38 = vadd.f32 %v2522_v1, %v2040_v20  ;;  %v1928_v24 = vpop.f32.mrb[13].mxu1 }
 0x65e   : > { %v2071_v10 = vadd.f32 %v2039_v60, %v1928_v24 }
 0x65f   : > { %2104 = vst [vmem:[%s3300_s14 + $0x68] sm:$0xff] %v2072_v38 }
 0x660   : > { %2103 = vst [vmem:[%s3300_s14 + $0x60] sm:$0xff] %v2071_v10 }
 0x664   : > { %v2525_v37 = vpop.f32.mrb[14].mxu1 }
 0x665   : > { %v2074_v11 = vadd.f32 %v2525_v37, %v2042_v32  ;;  %v1938_v29 = vpop.f32.mrb[15].mxu1 }
 0x666   : > { %v2073_v28 = vadd.f32 %v2041_v42, %v1938_v29 }
 0x667   : > { %2106 = vst [vmem:[%s3300_s14 + $0x78] sm:$0xff] %v2074_v11 }
 0x668   : > { %2105 = vst [vmem:[%s3300_s14 + $0x70] sm:$0xff] %v2073_v28  ;;  %v2528_v40 = vpop.f32.mrb[16].mxu1 }
 0x669   : > { %v2076_v43 = vadd.f32 %v2528_v40, %v2044_v2  ;;  %v1948_v25 = vpop.f32.mrb[17].mxu1 }
 0x66a   : > { %v2075_v51 = vadd.f32 %v2043_v34, %v1948_v25 }
 0x66b   : > { %2108 = vst [vmem:[%s3300_s14 + $0x88] sm:$0xff] %v2076_v43 }
 0x66c   : > { %2107 = vst [vmem:[%s3300_s14 + $0x80] sm:$0xff] %v2075_v51  ;;  %v2531_v63 = vpop.f32.mrb[18].mxu1 }
 0x66d   : > { %v2078_v46 = vadd.f32 %v2531_v63, %v2046_v48  ;;  %v1958_v50 = vpop.f32.mrb[19].mxu1 }
 0x66e   : > { %v2077_v8 = vadd.f32 %v2045_v61, %v1958_v50 }
 0x66f   : > { %2110 = vst [vmem:[%s3300_s14 + $0x98] sm:$0xff] %v2078_v46 }
 0x670   : > { %2109 = vst [vmem:[%s3300_s14 + $0x90] sm:$0xff] %v2077_v8  ;;  %v2534_v9 = vpop.f32.mrb[20].mxu1 }
 0x671   : > { %v2080_v54 = vadd.f32 %v2534_v9, %v2048_v14  ;;  %v1968_v55 = vpop.f32.mrb[21].mxu1 }
 0x672   : > { %v2079_v53 = vadd.f32 %v2047_v5, %v1968_v55 }
 0x673   : > { %2112 = vst [vmem:[%s3300_s14 + $0xa8] sm:$0xff] %v2080_v54 }
 0x674   : > { %2111 = vst [vmem:[%s3300_s14 + $0xa0] sm:$0xff] %v2079_v53  ;;  %v2537_v44 = vpop.f32.mrb[22].mxu1 }
 0x675   : > { %v2082_v49 = vadd.f32 %v2537_v44, %v2050_v3  ;;  %v1978_v16 = vpop.f32.mrb[23].mxu1 }
 0x676   : > { %v2081_v31 = vadd.f32 %v2049_v22, %v1978_v16 }
 0x677   : > { %2114 = vst [vmem:[%s3300_s14 + $0xb8] sm:$0xff] %v2082_v49 }
 0x678   : > { %2113 = vst [vmem:[%s3300_s14 + $0xb0] sm:$0xff] %v2081_v31  ;;  %v2540_v26 = vpop.f32.mrb[24].mxu1 }
 0x679   : > { %v2084_v41 = vadd.f32 %v2540_v26, %v2052_v47  ;;  %v1988_v15 = vpop.f32.mrb[25].mxu1 }
 0x67a   : > { %v2083_v0 = vadd.f32 %v2051_v21, %v1988_v15 }
 0x67b   : > { %2116 = vst [vmem:[%s3300_s14 + $0xc8] sm:$0xff] %v2084_v41 }
 0x67c   : > { %2115 = vst [vmem:[%s3300_s14 + $0xc0] sm:$0xff] %v2083_v0  ;;  %v2543_v58 = vpop.f32.mrb[26].mxu1 }
 0x67d   : > { %v2086_v27 = vadd.f32 %v2543_v58, %v2054_v12  ;;  %v1998_v62 = vpop.f32.mrb[27].mxu1 }
 0x67e   : > { %v2085_v23 = vadd.f32 %v2053_v57, %v1998_v62 }
 0x67f   : > { %2118 = vst [vmem:[%s3300_s14 + $0xd8] sm:$0xff] %v2086_v27 }
 0x680   : > { %2117 = vst [vmem:[%s3300_s14 + $0xd0] sm:$0xff] %v2085_v23  ;;  %v2546_v35 = vpop.f32.mrb[28].mxu1 }
 0x681   : > { %v2088_v6 = vadd.f32 %v2546_v35, %v2056_v13  ;;  %v2008_v56 = vpop.f32.mrb[29].mxu1 }
 0x682   : > { %v2087_v19 = vadd.f32 %v2055_v33, %v2008_v56 }
 0x683   : > { %2120 = vst [vmem:[%s3300_s14 + $0xe8] sm:$0xff] %v2088_v6 }
 0x684   : > { %2119 = vst [vmem:[%s3300_s14 + $0xe0] sm:$0xff] %v2087_v19  ;;  %v2549_v18 = vpop.f32.mrb[30].mxu1 }
 0x685   : > { %v2090_v4 = vadd.f32 %v2549_v18, %v2058_v39  ;;  %v2018_v45 = vpop.f32.mrb[31].mxu1 }
 0x686   : > { %v2089_v36 = vadd.f32 %v2057_v7, %v2018_v45 }
 0x687   : > { %2122 = vst [vmem:[%s3300_s14 + $0xf8] sm:$0xff] %v2090_v4 }
 0x688   : > { %2121 = vst [vmem:[%s3300_s14 + $0xf0] sm:$0xff] %v2089_v36 }
 0x689   : > { %2961 = shalt.err (!%p2958_p11)
}
 0x68a   : > { %s2962_s14 = scalar_lea.hbm %s4608_s21, 4096  ;;  %s2966_s30 = scalar_lea.hbm %s4681_s3, 8192 }
 0x68b   : > { %p2963_p4 = scmp.ne.s32.totalorder %s4608_s21, %s2962_s14  ;;  %p2967_p9 = scmp.lt.u32.totalorder %s4608_s21, %s4681_s3 }
 0x68c   : > { %p2968_p6 = scmp.lt.u32.totalorder %s2966_s30, %s2962_s14  ;;  %p2970_p2 = scmp.lt.u32.totalorder %s2962_s14, %s4608_s21 }
 0x68d   : > { %p2964_p12 = pnand %p2963_p4, %p4715_p5 }
 0x68e   : > { %p2969_p0 = por %p2968_p6, %p2967_p9 }
 0x68f   : > { %p2965_p10 = pneg %p2964_p12 }
 0x690   : > { %p2971_p8 = por %p2970_p2, %p2969_p0 }
 0x692   : > { %p2972_p13 = pnand %p2971_p8, %p2965_p10 }
 0x694   : > { %2975 = shalt.err (!%p2972_p13)
}
 0x695   : > { %s3086_s28 = smov 128   ;;  %s3087_s29 = smov 8  }
 0x696   : > { %2680 = dma.vmem_to_hbm [thread:$0]  (%p4715_p5), %s4610_s20, 4096, %s4608_s21, %s2124_s22, %s3086_s28, %s3086_s28, %s3087_s29  }
 0x697 PF: > { %s4716_s24 = sld [smem:[#allocation19_spill]]  ;;  %p2696_p3 = scmp.ge.s32.totalorder %s3074_s25, 2 }
 0x698   : > { %s2176_s0 = sand.u32 1, %s3046_s18  }
 0x699   : > { %s2177_s7 = scalar_lea.sflag [#allocation7], %s2176_s0 }
 0x69d   : > { %p4717_p1 = scmp.ne.s32.totalorder %s4716_s24, 0 }
 0x69f   : > { %p2689_p7 = pnand %p2696_p3, %p4717_p1 }
 0x6a1   : > { %3025 = dma.done.wait (!%p2689_p7), %s2177_s7, 4096  }
 0x6a2   : > { %3027 = vsyncadd (!%p2689_p7), %s2177_s7, 4294963200  ;;  %s2185_s23 = sand.u32 1, %s3034_s15   ;;  %p4718_p11 = scmp.ne.s32.totalorder %s4707_s11, 0 }
 0x6a3   : > { %s2186_s5 = scalar_lea.sflag [#allocation10], %s2185_s23 }
 0x6a4   : > { %p2692_p4 = pnand %p2696_p3, %p4718_p11 }
 0x6a6   : > { %3029 = dma.done.wait (!%p2692_p4), %s2186_s5, 4096  }
 0x6a7   : > { %3031 = vsyncadd (!%p2692_p4), %s2186_s5, 4294963200  ;;  %s24_s25 = sadd.s32 1, %s3074_s25   ;;  %s4719_s9 = sld [smem:[#allocation14_spill]] }
 0x6a8   : > { %p21_p5 = scmp.ge.s32.totalorder %s24_s25, 6   ;;  %s4720_s20 = sld [smem:[#allocation20_spill]] }
 0x6a9   : > { %s4721_s21 = sld [smem:[#allocation15_spill]]  ;;  %s4722_s22 = sld [smem:[#allocation16_spill]] }
 0x6aa   : > { %s4723_s23 = sld [smem:[#allocation17_spill]]  ;;  %s4724_s24 = sld [smem:[#allocation18_spill]] }
 0x6ab   : > { %s4725_s15 = smov %s3038_s16  ;;  %s4726_s16 = smov %s3042_s17 }
 0x6ac   : > { %s4727_s17 = smov %s3224_s27  ;;  %s4728_s18 = smov %s3050_s19 }
 0x6ad   : > { %s4729_s19 = smov %s4719_s9  ;;  %23 = sbr.rel (!%p21_p5) target bundleno = 13 (0xd), region = 100 }
 0x6b4   :  { %2191 = vsyncpa [#allocation6], 1 }
 0x6b5   :  { %2193 = vsyncpa [#allocation6 + $0x1], 1 }
 0x6b6   :  { %2194 = vsyncpa [#allocation7], 1 }
 0x6b7   :  { %2196 = vsyncpa [#allocation7 + $0x1], 1 }
 0x6b8   :  { %2197 = vsyncpa [#allocation10], 1 }
 0x6b9   :  { %2199 = vsyncpa [#allocation10 + $0x1], 1 }

</bundles_post_ra>
